<compile_context>
chip_gen: v6e
topology: v6e:2x2x1
jax: 0.10.0
libtpu: 0.0.40
codegen_flags: <defaults>
</compile_context>

<pallas_src>
import math
import jax
import jax.numpy as jnp
from jax import lax
from jax.experimental import pallas as pl
from jax.experimental.pallas import tpu as pltpu

# ----------------------------- config (small, consistent with the module) ----
B, S, D = 2, 8, 32            # batch, max_seq_len, dim
NUM_HEAD, HEAD_DIM = 2, 16    # num_head, head_dim
LINFORMER_K = 4               # linformer_k
HIDDEN_DIM = 64               # hidden_dim
NUM_LAYERS = 2                # num_layers
SHARED_WEIGHT = False         # config['shared_weight']
EPS = 1e-5                    # nn.LayerNorm default eps
HD = NUM_HEAD * HEAD_DIM      # combined head width


def _layernorm(x, g, b):
    # x: (S, D), g/b: (1, D)
    mu = jnp.mean(x, axis=-1, keepdims=True)
    var = jnp.mean((x - mu) ** 2, axis=-1, keepdims=True)
    return (x - mu) * lax.rsqrt(var + EPS) * g + b


# ------------------------------- fused Pallas kernel -------------------------------
def backbone_kernel(x_ref, mask_ref,
                    ln1_g_ref, ln1_b_ref,
                    wqkv_ref, bqkv_ref,
                    e_ref, wo_ref, bo_ref,
                    ln2_g_ref, ln2_b_ref,
                    w1_ref, b1_ref, w2_ref, b2_ref,
                    fin_g_ref, fin_b_ref,
                    out_ref):
    # Block refs for x / mask / out have a leading size-1 batch-block dim.
    x = x_ref[0]          # (S, D)
    m = mask_ref[0]       # (S, 1)
    inv_sqrt_dh = 1.0 / math.sqrt(HEAD_DIM)
    inv_sqrt2 = 1.0 / math.sqrt(2.0)

    for li in range(NUM_LAYERS):          # static loop over layers, x stays on-chip
        # ---- hoisted per-layer weight reads (once per layer) ----
        ln1_g, ln1_b = ln1_g_ref[li], ln1_b_ref[li]       # (1, D)
        wqkv, bqkv = wqkv_ref[li], bqkv_ref[li]           # (D, 3*HD), (1, 3*HD)
        wo, bo = wo_ref[li], bo_ref[li]                   # (HD, D), (1, D)
        ln2_g, ln2_b = ln2_g_ref[li], ln2_b_ref[li]       # (1, D)
        w1, b1 = w1_ref[li], b1_ref[li]                   # (D, HID), (1, HID)
        w2, b2 = w2_ref[li], b2_ref[li]                   # (HID, D), (1, D)

        # ---- LayerNorm 1 + fused QKV projection (one wide matmul) ----
        h = _layernorm(x, ln1_g, ln1_b)                                           # (S, D)
        qkv = jnp.dot(h, wqkv, preferred_element_type=jnp.float32) + bqkv          # (S, 3*HD)
        q = qkv[:, 0 * HD:1 * HD]
        k = qkv[:, 1 * HD:2 * HD] * m          # mask K / V (matches reference)
        v = qkv[:, 2 * HD:3 * HD] * m

        # ---- Linformer attention core (per head; tiny (8,16)/(4,16) tiles) ----
        head_outs = []
        for hh in range(NUM_HEAD):
            lo, hi = hh * HEAD_DIM, (hh + 1) * HEAD_DIM
            qh, kh, vh = q[:, lo:hi], k[:, lo:hi], v[:, lo:hi]                     # (S, Dh)
            e_h = e_ref[li * NUM_HEAD + hh]                                        # (k, S)

            kp = jnp.dot(e_h, kh, preferred_element_type=jnp.float32)              # (k, Dh)
            vp = jnp.dot(e_h, vh, preferred_element_type=jnp.float32)              # (k, Dh)

            # scores = qh @ kp^T (contract head_dim on both; no explicit transpose op)
            scores = lax.dot_general(qh, kp, (((1,), (1,)), ((), ())),
                                     preferred_element_type=jnp.float32)            # (S, k)
            scores = scores * inv_sqrt_dh
            scores = scores - jnp.max(scores, axis=-1, keepdims=True)
            p = jnp.exp(scores)
            # EUP approximate reciprocal instead of a VALU divide
            p = p * pl.reciprocal(jnp.sum(p, axis=-1, keepdims=True), approx=True)
            head_outs.append(jnp.dot(p, vp, preferred_element_type=jnp.float32))    # (S, Dh)

        # combine heads + single output projection + residual
        attn = jnp.concatenate(head_outs, axis=-1)                                  # (S, HD)
        x = jnp.dot(attn, wo, preferred_element_type=jnp.float32) + bo + x
        # dropout1 is identity in eval mode

        # ---- LayerNorm 2 + MLP (Linear -> exact GELU -> Linear) + residual ----
        h2 = _layernorm(x, ln2_g, ln2_b)
        z = jnp.dot(h2, w1, preferred_element_type=jnp.float32) + b1
        z = 0.5 * z * (1.0 + lax.erf(z * inv_sqrt2))   # exact GELU (matches nn.GELU)
        z = jnp.dot(z, w2, preferred_element_type=jnp.float32) + b2
        # mlp dropouts are identity in eval mode
        x = x + z

    # ---- final LayerNorm * mask ----
    out_ref[0] = _layernorm(x, fin_g_ref[...], fin_b_ref[...]) * m


# ------------------------------- wrapper --------------------------------------
def _full_spec(arr):
    """Whole-array block, same block for every grid step (weights)."""
    nd = arr.ndim
    return pl.BlockSpec(arr.shape, lambda b, nd=nd: (0,) * nd)


def backbone_forward(x, mask, fused, final_g, final_b):
    mask3 = mask[:, :, None].astype(jnp.float32)      # (B, S, 1)
    args = [x, mask3,
            fused['ln1_g'], fused['ln1_b'],
            fused['wqkv'], fused['bqkv'],
            fused['E'], fused['wo'], fused['bo'],
            fused['ln2_g'], fused['ln2_b'],
            fused['w1'], fused['b1'], fused['w2'], fused['b2'],
            final_g, final_b]
    in_specs = [
        pl.BlockSpec((1, S, D), lambda b: (b, 0, 0)),   # x: one batch element per program
        pl.BlockSpec((1, S, 1), lambda b: (b, 0, 0)),   # mask
    ] + [_full_spec(a) for a in args[2:]]               # all weights fully VMEM-resident

    return pl.pallas_call(
        backbone_kernel,
        out_shape=jax.ShapeDtypeStruct(x.shape, jnp.float32),
        grid=(B,),
        in_specs=in_specs,
        out_specs=pl.BlockSpec((1, S, D), lambda b: (b, 0, 0)),
        compiler_params=pltpu.CompilerParams(dimension_semantics=("parallel",)),
    )(*args)


# ------------------------------- parameter init --------------------------------
def init_block_params(key):
    ks = jax.random.split(key, 8)
    hdd = HEAD_DIM

    def nrm(k, shape, scale=0.1):
        return jax.random.normal(k, shape, jnp.float32) * scale

    return {
        'ln1_g': jnp.ones((1, D), jnp.float32),
        'ln1_b': jnp.zeros((1, D), jnp.float32),
        # per-head: (H, D, Dh) for q/k/v, (H, Dh, D) for output proj
        'wq': nrm(ks[0], (NUM_HEAD, D, hdd)),
        'bq': jnp.zeros((NUM_HEAD, 1, hdd), jnp.float32),
        'wk': nrm(ks[1], (NUM_HEAD, D, hdd)),
        'bk': jnp.zeros((NUM_HEAD, 1, hdd), jnp.float32),
        'wv': nrm(ks[2], (NUM_HEAD, D, hdd)),
        'bv': jnp.zeros((NUM_HEAD, 1, hdd), jnp.float32),
        # Linformer projection E: (H, k, S), randn / sqrt(k) as in the module
        'E': jax.random.normal(ks[3], (NUM_HEAD, LINFORMER_K, S), jnp.float32)
             / math.sqrt(LINFORMER_K),
        'wo': nrm(ks[4], (NUM_HEAD, hdd, D)),
        'bo': jnp.zeros((1, D), jnp.float32),
        'ln2_g': jnp.ones((1, D), jnp.float32),
        'ln2_b': jnp.zeros((1, D), jnp.float32),
        'w1': nrm(ks[5], (D, HIDDEN_DIM)),
        'b1': jnp.zeros((1, HIDDEN_DIM), jnp.float32),
        'w2': nrm(ks[6], (HIDDEN_DIM, D)),
        'b2': jnp.zeros((1, D), jnp.float32),
    }


def build_fused_params(layer_params):
    """Merge per-head QKV / output weights and stack along a leading layer axis."""
    def fuse_one(p):
        wq = jnp.transpose(p['wq'], (1, 0, 2)).reshape(D, HD)
        wk = jnp.transpose(p['wk'], (1, 0, 2)).reshape(D, HD)
        wv = jnp.transpose(p['wv'], (1, 0, 2)).reshape(D, HD)
        wqkv = jnp.concatenate([wq, wk, wv], axis=1)                     # (D, 3*HD)
        bqkv = jnp.concatenate([p['bq'].reshape(1, HD),
                                p['bk'].reshape(1, HD),
                                p['bv'].reshape(1, HD)], axis=1)         # (1, 3*HD)
        wo = p['wo'].reshape(HD, D)                                      # concat-heads proj
        return {
            'ln1_g': p['ln1_g'], 'ln1_b': p['ln1_b'],
            'wqkv': wqkv, 'bqkv': bqkv,
            'E': p['E'], 'wo': wo, 'bo': p['bo'],
            'ln2_g': p['ln2_g'], 'ln2_b': p['ln2_b'],
            'w1': p['w1'], 'b1': p['b1'], 'w2': p['w2'], 'b2': p['b2'],
        }

    fused = [fuse_one(p) for p in layer_params]
    out = {k: jnp.stack([f[k] for f in fused], axis=0) for k in fused[0]}
    # flatten (L, H, k, S) -> (L*H, k, S) so the kernel indexes a single leading dim
    out['E'] = out['E'].reshape(NUM_LAYERS * NUM_HEAD, LINFORMER_K, S)
    return out


# ------------------------------- pure-JAX reference ----------------------------
def reference_forward(x, mask, layer_params, final_g, final_b):
    def ln(t, g, b):
        mu = t.mean(-1, keepdims=True)
        var = ((t - mu) ** 2).mean(-1, keepdims=True)
        return (t - mu) / jnp.sqrt(var + EPS) * g.reshape(-1) + b.reshape(-1)

    mf = mask.astype(jnp.float32)
    hp = 'highest'
    for p in layer_params:
        h = ln(x, p['ln1_g'], p['ln1_b'])
        Q = jnp.einsum('bsd,hdf->bhsf', h, p['wq'], precision=hp) + p['bq'][None]
        K = jnp.einsum('bsd,hdf->bhsf', h, p['wk'], precision=hp) + p['bk'][None]
        V = jnp.einsum('bsd,hdf->bhsf', h, p['wv'], precision=hp) + p['bv'][None]
        K = K * mf[:, None, :, None]
        V = V * mf[:, None, :, None]
        Kp = jnp.einsum('hks,bhsf->bhkf', p['E'], K, precision=hp)
        Vp = jnp.einsum('hks,bhsf->bhkf', p['E'], V, precision=hp)
        dot = jnp.einsum('bhsf,bhkf->bhsk', Q, Kp, precision=hp) / math.sqrt(HEAD_DIM)
        attn = jax.nn.softmax(dot, axis=-1)
        Xa = jnp.einsum('bhsk,bhkf->bhsf', attn, Vp, precision=hp)
        out = jnp.einsum('bhsf,hfd->bsd', Xa, p['wo'], precision=hp) + p['bo'].reshape(-1)
        x = out + x
        h2 = ln(x, p['ln2_g'], p['ln2_b'])
        z = jnp.einsum('bsd,de->bse', h2, p['w1'], precision=hp) + p['b1'].reshape(-1)
        z = 0.5 * z * (1.0 + lax.erf(z / math.sqrt(2.0)))
        z = jnp.einsum('bse,ed->bsd', z, p['w2'], precision=hp) + p['b2'].reshape(-1)
        x = z + x
    return ln(x, final_g, final_b) * mf[:, :, None]


# ------------------------------- main -------------------------------------------
if __name__ == "__main__":
    key = jax.random.PRNGKey(0)
    k_x, k_p = jax.random.split(key)

    x = jax.random.normal(k_x, (B, S, D), jnp.float32)
    mask = jnp.ones((B, S), jnp.float32).at[1, 6:].set(0.0)   # deterministic padding mask

    if SHARED_WEIGHT:
        shared = init_block_params(k_p)
        layer_params = [shared] * NUM_LAYERS
    else:
        layer_keys = jax.random.split(k_p, NUM_LAYERS)
        layer_params = [init_block_params(k) for k in layer_keys]

    final_g = jnp.ones((1, D), jnp.float32)
    final_b = jnp.zeros((1, D), jnp.float32)

    fused = build_fused_params(layer_params)

    out = backbone_forward(x, mask, fused, final_g, final_b)
    out = jax.block_until_ready(out)

    ref = reference_forward(x, mask, layer_params, final_g, final_b)
    assert out.shape == (B, S, D)
    # Tolerance stays loose-ish: the kernel uses the EUP approximate reciprocal in softmax
    # and the MXU's default f32 matmul path vs. the 'highest'-precision reference.
    assert bool(jnp.allclose(out, ref, atol=2e-2, rtol=2e-2)), "mismatch vs pure-JAX reference"

    # TODO(synk): dropout layers are identity here (eval-mode); training-mode RNG dropout not emitted.
    print("KERNEL_OK")
</pallas_src>

<mosaic_0001>
module attributes {stable_mosaic.version = 11 : i64} {
  func.func @backbone_kernel(%arg0: i32, %arg1: memref<1x8x32xf32, #tpu.memory_space<vmem>>, %arg2: memref<1x8x1xf32, #tpu.memory_space<vmem>>, %arg3: memref<2x1x32xf32, #tpu.memory_space<vmem>>, %arg4: memref<2x1x32xf32, #tpu.memory_space<vmem>>, %arg5: memref<2x32x96xf32, #tpu.memory_space<vmem>>, %arg6: memref<2x1x96xf32, #tpu.memory_space<vmem>>, %arg7: memref<4x4x8xf32, #tpu.memory_space<vmem>>, %arg8: memref<2x32x32xf32, #tpu.memory_space<vmem>>, %arg9: memref<2x1x32xf32, #tpu.memory_space<vmem>>, %arg10: memref<2x1x32xf32, #tpu.memory_space<vmem>>, %arg11: memref<2x1x32xf32, #tpu.memory_space<vmem>>, %arg12: memref<2x32x64xf32, #tpu.memory_space<vmem>>, %arg13: memref<2x1x64xf32, #tpu.memory_space<vmem>>, %arg14: memref<2x64x32xf32, #tpu.memory_space<vmem>>, %arg15: memref<2x1x32xf32, #tpu.memory_space<vmem>>, %arg16: memref<1x32xf32, #tpu.memory_space<vmem>>, %arg17: memref<1x32xf32, #tpu.memory_space<vmem>>, %arg18: memref<1x8x32xf32, #tpu.memory_space<vmem>>) attributes {dimension_semantics = [#tpu.dimension_semantics<parallel>], iteration_bounds = array<i64: 2>, scalar_prefetch = 0 : i64, scratch_operands = 0 : i64, tpu.core_type = #tpu.core_type<tc>, window_params = [{transform_indices = @transform_0, window_bounds = array<i64: 1, 8, 32>}, {transform_indices = @transform_1, window_bounds = array<i64: 1, 8, 1>}, {pipeline_mode = #tpu.pipeline_mode<synchronous>, transform_indices = @transform_2, window_bounds = array<i64: 2, 1, 32>}, {pipeline_mode = #tpu.pipeline_mode<synchronous>, transform_indices = @transform_3, window_bounds = array<i64: 2, 1, 32>}, {pipeline_mode = #tpu.pipeline_mode<synchronous>, transform_indices = @transform_4, window_bounds = array<i64: 2, 32, 96>}, {pipeline_mode = #tpu.pipeline_mode<synchronous>, transform_indices = @transform_5, window_bounds = array<i64: 2, 1, 96>}, {pipeline_mode = #tpu.pipeline_mode<synchronous>, transform_indices = @transform_6, window_bounds = array<i64: 4, 4, 8>}, {pipeline_mode = #tpu.pipeline_mode<synchronous>, transform_indices = @transform_7, window_bounds = array<i64: 2, 32, 32>}, {pipeline_mode = #tpu.pipeline_mode<synchronous>, transform_indices = @transform_8, window_bounds = array<i64: 2, 1, 32>}, {pipeline_mode = #tpu.pipeline_mode<synchronous>, transform_indices = @transform_9, window_bounds = array<i64: 2, 1, 32>}, {pipeline_mode = #tpu.pipeline_mode<synchronous>, transform_indices = @transform_10, window_bounds = array<i64: 2, 1, 32>}, {pipeline_mode = #tpu.pipeline_mode<synchronous>, transform_indices = @transform_11, window_bounds = array<i64: 2, 32, 64>}, {pipeline_mode = #tpu.pipeline_mode<synchronous>, transform_indices = @transform_12, window_bounds = array<i64: 2, 1, 64>}, {pipeline_mode = #tpu.pipeline_mode<synchronous>, transform_indices = @transform_13, window_bounds = array<i64: 2, 64, 32>}, {pipeline_mode = #tpu.pipeline_mode<synchronous>, transform_indices = @transform_14, window_bounds = array<i64: 2, 1, 32>}, {pipeline_mode = #tpu.pipeline_mode<synchronous>, transform_indices = @transform_15, window_bounds = array<i64: 1, 32>}, {pipeline_mode = #tpu.pipeline_mode<synchronous>, transform_indices = @transform_16, window_bounds = array<i64: 1, 32>}, {transform_indices = @transform_17, window_bounds = array<i64: 1, 8, 32>}]} {
    %c0 = arith.constant 0 : index
    %c0_0 = arith.constant 0 : index
    %c0_1 = arith.constant 0 : index
    %0 = vector.load %arg1[%c0, %c0_0, %c0_1] : memref<1x8x32xf32, #tpu.memory_space<vmem>>, vector<1x8x32xf32>
    %1 = vector.shape_cast %0 : vector<1x8x32xf32> to vector<8x32xf32>
    %c0_2 = arith.constant 0 : index
    %c0_3 = arith.constant 0 : index
    %c0_4 = arith.constant 0 : index
    %2 = vector.load %arg2[%c0_2, %c0_3, %c0_4] : memref<1x8x1xf32, #tpu.memory_space<vmem>>, vector<1x8x1xf32>
    %3 = vector.shape_cast %2 : vector<1x8x1xf32> to vector<8x1xf32>
    %c0_5 = arith.constant 0 : index
    %c0_6 = arith.constant 0 : index
    %c0_7 = arith.constant 0 : index
    %4 = vector.load %arg3[%c0_5, %c0_6, %c0_7] : memref<2x1x32xf32, #tpu.memory_space<vmem>>, vector<1x1x32xf32>
    %5 = vector.shape_cast %4 : vector<1x1x32xf32> to vector<1x32xf32>
    %c0_8 = arith.constant 0 : index
    %c0_9 = arith.constant 0 : index
    %c0_10 = arith.constant 0 : index
    %6 = vector.load %arg4[%c0_8, %c0_9, %c0_10] : memref<2x1x32xf32, #tpu.memory_space<vmem>>, vector<1x1x32xf32>
    %7 = vector.shape_cast %6 : vector<1x1x32xf32> to vector<1x32xf32>
    %c0_11 = arith.constant 0 : index
    %c0_12 = arith.constant 0 : index
    %c0_13 = arith.constant 0 : index
    %8 = vector.load %arg5[%c0_11, %c0_12, %c0_13] : memref<2x32x96xf32, #tpu.memory_space<vmem>>, vector<1x32x96xf32>
    %9 = vector.shape_cast %8 : vector<1x32x96xf32> to vector<32x96xf32>
    %c0_14 = arith.constant 0 : index
    %c0_15 = arith.constant 0 : index
    %c0_16 = arith.constant 0 : index
    %10 = vector.load %arg6[%c0_14, %c0_15, %c0_16] : memref<2x1x96xf32, #tpu.memory_space<vmem>>, vector<1x1x96xf32>
    %11 = vector.shape_cast %10 : vector<1x1x96xf32> to vector<1x96xf32>
    %c0_17 = arith.constant 0 : index
    %c0_18 = arith.constant 0 : index
    %c0_19 = arith.constant 0 : index
    %12 = vector.load %arg8[%c0_17, %c0_18, %c0_19] : memref<2x32x32xf32, #tpu.memory_space<vmem>>, vector<1x32x32xf32>
    %13 = vector.shape_cast %12 : vector<1x32x32xf32> to vector<32x32xf32>
    %c0_20 = arith.constant 0 : index
    %c0_21 = arith.constant 0 : index
    %c0_22 = arith.constant 0 : index
    %14 = vector.load %arg9[%c0_20, %c0_21, %c0_22] : memref<2x1x32xf32, #tpu.memory_space<vmem>>, vector<1x1x32xf32>
    %15 = vector.shape_cast %14 : vector<1x1x32xf32> to vector<1x32xf32>
    %c0_23 = arith.constant 0 : index
    %c0_24 = arith.constant 0 : index
    %c0_25 = arith.constant 0 : index
    %16 = vector.load %arg10[%c0_23, %c0_24, %c0_25] : memref<2x1x32xf32, #tpu.memory_space<vmem>>, vector<1x1x32xf32>
    %17 = vector.shape_cast %16 : vector<1x1x32xf32> to vector<1x32xf32>
    %c0_26 = arith.constant 0 : index
    %c0_27 = arith.constant 0 : index
    %c0_28 = arith.constant 0 : index
    %18 = vector.load %arg11[%c0_26, %c0_27, %c0_28] : memref<2x1x32xf32, #tpu.memory_space<vmem>>, vector<1x1x32xf32>
    %19 = vector.shape_cast %18 : vector<1x1x32xf32> to vector<1x32xf32>
    %c0_29 = arith.constant 0 : index
    %c0_30 = arith.constant 0 : index
    %c0_31 = arith.constant 0 : index
    %20 = vector.load %arg12[%c0_29, %c0_30, %c0_31] : memref<2x32x64xf32, #tpu.memory_space<vmem>>, vector<1x32x64xf32>
    %21 = vector.shape_cast %20 : vector<1x32x64xf32> to vector<32x64xf32>
    %c0_32 = arith.constant 0 : index
    %c0_33 = arith.constant 0 : index
    %c0_34 = arith.constant 0 : index
    %22 = vector.load %arg13[%c0_32, %c0_33, %c0_34] : memref<2x1x64xf32, #tpu.memory_space<vmem>>, vector<1x1x64xf32>
    %23 = vector.shape_cast %22 : vector<1x1x64xf32> to vector<1x64xf32>
    %c0_35 = arith.constant 0 : index
    %c0_36 = arith.constant 0 : index
    %c0_37 = arith.constant 0 : index
    %24 = vector.load %arg14[%c0_35, %c0_36, %c0_37] : memref<2x64x32xf32, #tpu.memory_space<vmem>>, vector<1x64x32xf32>
    %25 = vector.shape_cast %24 : vector<1x64x32xf32> to vector<64x32xf32>
    %c0_38 = arith.constant 0 : index
    %c0_39 = arith.constant 0 : index
    %c0_40 = arith.constant 0 : index
    %26 = vector.load %arg15[%c0_38, %c0_39, %c0_40] : memref<2x1x32xf32, #tpu.memory_space<vmem>>, vector<1x1x32xf32>
    %27 = vector.shape_cast %26 : vector<1x1x32xf32> to vector<1x32xf32>
    %cst = arith.constant dense<0.000000e+00> : vector<8xf32>
    %28 = vector.multi_reduction <add>, %1, %cst [1] : vector<8x32xf32> to vector<8xf32>
    %29 = vector.shape_cast %28 : vector<8xf32> to vector<8x1xf32>
    %cst_41 = arith.constant 3.200000e+01 : f32
    %30 = vector.broadcast %cst_41 : f32 to vector<8x1xf32>
    %31 = arith.divf %29, %30 : vector<8x1xf32>
    %32 = vector.broadcast %31 : vector<8x1xf32> to vector<8x32xf32>
    %33 = arith.subf %1, %32 : vector<8x32xf32>
    %34 = arith.mulf %33, %33 : vector<8x32xf32>
    %cst_42 = arith.constant dense<0.000000e+00> : vector<8xf32>
    %35 = vector.multi_reduction <add>, %34, %cst_42 [1] : vector<8x32xf32> to vector<8xf32>
    %36 = vector.shape_cast %35 : vector<8xf32> to vector<8x1xf32>
    %cst_43 = arith.constant 3.200000e+01 : f32
    %37 = vector.broadcast %cst_43 : f32 to vector<8x1xf32>
    %38 = arith.divf %36, %37 : vector<8x1xf32>
    %39 = vector.broadcast %31 : vector<8x1xf32> to vector<8x32xf32>
    %40 = arith.subf %1, %39 : vector<8x32xf32>
    %cst_44 = arith.constant 9.99999974E-6 : f32
    %41 = vector.broadcast %cst_44 : f32 to vector<8x1xf32>
    %42 = arith.addf %38, %41 : vector<8x1xf32>
    %43 = math.rsqrt %42 : vector<8x1xf32>
    %44 = vector.broadcast %43 : vector<8x1xf32> to vector<8x32xf32>
    %45 = arith.mulf %40, %44 : vector<8x32xf32>
    %46 = vector.broadcast %5 : vector<1x32xf32> to vector<8x32xf32>
    %47 = arith.mulf %45, %46 : vector<8x32xf32>
    %48 = vector.broadcast %7 : vector<1x32xf32> to vector<8x32xf32>
    %49 = arith.addf %47, %48 : vector<8x32xf32>
    %cst_45 = arith.constant dense<0.000000e+00> : vector<8x96xf32>
    %50 = tpu.matmul %49, %9, %cst_45 {dimension_numbers = #tpu.dot_dimension_numbers<[1], [0], [0], [1], [0, 0, 1, 1], [], []>} : vector<8x32xf32>, vector<32x96xf32>, vector<8x96xf32> -> vector<8x96xf32>
    %51 = vector.broadcast %11 : vector<1x96xf32> to vector<8x96xf32>
    %52 = arith.addf %50, %51 : vector<8x96xf32>
    %53 = vector.extract_strided_slice %52 {offsets = [0, 0], sizes = [8, 32], strides = [1, 1]} : vector<8x96xf32> to vector<8x32xf32>
    %54 = vector.extract_strided_slice %52 {offsets = [0, 32], sizes = [8, 32], strides = [1, 1]} : vector<8x96xf32> to vector<8x32xf32>
    %55 = vector.broadcast %3 : vector<8x1xf32> to vector<8x32xf32>
    %56 = arith.mulf %54, %55 : vector<8x32xf32>
    %57 = vector.extract_strided_slice %52 {offsets = [0, 64], sizes = [8, 32], strides = [1, 1]} : vector<8x96xf32> to vector<8x32xf32>
    %58 = vector.broadcast %3 : vector<8x1xf32> to vector<8x32xf32>
    %59 = arith.mulf %57, %58 : vector<8x32xf32>
    %60 = vector.extract_strided_slice %53 {offsets = [0, 0], sizes = [8, 16], strides = [1, 1]} : vector<8x32xf32> to vector<8x16xf32>
    %61 = vector.extract_strided_slice %56 {offsets = [0, 0], sizes = [8, 16], strides = [1, 1]} : vector<8x32xf32> to vector<8x16xf32>
    %62 = vector.extract_strided_slice %59 {offsets = [0, 0], sizes = [8, 16], strides = [1, 1]} : vector<8x32xf32> to vector<8x16xf32>
    %c0_46 = arith.constant 0 : index
    %c0_47 = arith.constant 0 : index
    %c0_48 = arith.constant 0 : index
    %63 = vector.load %arg7[%c0_46, %c0_47, %c0_48] : memref<4x4x8xf32, #tpu.memory_space<vmem>>, vector<1x4x8xf32>
    %64 = vector.shape_cast %63 : vector<1x4x8xf32> to vector<4x8xf32>
    %cst_49 = arith.constant dense<0.000000e+00> : vector<4x16xf32>
    %65 = tpu.matmul %64, %61, %cst_49 {dimension_numbers = #tpu.dot_dimension_numbers<[1], [0], [0], [1], [0, 0, 1, 1], [], []>} : vector<4x8xf32>, vector<8x16xf32>, vector<4x16xf32> -> vector<4x16xf32>
    %cst_50 = arith.constant dense<0.000000e+00> : vector<4x16xf32>
    %66 = tpu.matmul %64, %62, %cst_50 {dimension_numbers = #tpu.dot_dimension_numbers<[1], [0], [0], [1], [0, 0, 1, 1], [], []>} : vector<4x8xf32>, vector<8x16xf32>, vector<4x16xf32> -> vector<4x16xf32>
    %cst_51 = arith.constant dense<0.000000e+00> : vector<8x4xf32>
    %67 = tpu.matmul %60, %65, %cst_51 {dimension_numbers = #tpu.dot_dimension_numbers<[1], [1], [0], [0], [0, 0, 1, 0], [], []>} : vector<8x16xf32>, vector<4x16xf32>, vector<8x4xf32> -> vector<8x4xf32>
    %cst_52 = arith.constant 2.500000e-01 : f32
    %68 = vector.broadcast %cst_52 : f32 to vector<8x4xf32>
    %69 = arith.mulf %67, %68 : vector<8x4xf32>
    %cst_53 = arith.constant dense<0xFF800000> : vector<8xf32>
    %70 = vector.multi_reduction <maximumf>, %69, %cst_53 [1] : vector<8x4xf32> to vector<8xf32>
    %71 = vector.shape_cast %70 : vector<8xf32> to vector<8x1xf32>
    %72 = vector.broadcast %71 : vector<8x1xf32> to vector<8x4xf32>
    %73 = arith.subf %69, %72 : vector<8x4xf32>
    %74 = math.exp %73 : vector<8x4xf32>
    %cst_54 = arith.constant dense<0.000000e+00> : vector<8xf32>
    %75 = vector.multi_reduction <add>, %74, %cst_54 [1] : vector<8x4xf32> to vector<8xf32>
    %76 = vector.shape_cast %75 : vector<8xf32> to vector<8x1xf32>
    %77 = tpu.reciprocal %76 {approx = true} : vector<8x1xf32> -> vector<8x1xf32>
    %78 = vector.broadcast %77 : vector<8x1xf32> to vector<8x4xf32>
    %79 = arith.mulf %74, %78 : vector<8x4xf32>
    %cst_55 = arith.constant dense<0.000000e+00> : vector<8x16xf32>
    %80 = tpu.matmul %79, %66, %cst_55 {dimension_numbers = #tpu.dot_dimension_numbers<[1], [0], [0], [1], [0, 0, 1, 1], [], []>} : vector<8x4xf32>, vector<4x16xf32>, vector<8x16xf32> -> vector<8x16xf32>
    %81 = vector.extract_strided_slice %53 {offsets = [0, 16], sizes = [8, 16], strides = [1, 1]} : vector<8x32xf32> to vector<8x16xf32>
    %82 = vector.extract_strided_slice %56 {offsets = [0, 16], sizes = [8, 16], strides = [1, 1]} : vector<8x32xf32> to vector<8x16xf32>
    %83 = vector.extract_strided_slice %59 {offsets = [0, 16], sizes = [8, 16], strides = [1, 1]} : vector<8x32xf32> to vector<8x16xf32>
    %c1 = arith.constant 1 : index
    %c0_56 = arith.constant 0 : index
    %c0_57 = arith.constant 0 : index
    %84 = vector.load %arg7[%c1, %c0_56, %c0_57] : memref<4x4x8xf32, #tpu.memory_space<vmem>>, vector<1x4x8xf32>
    %85 = vector.shape_cast %84 : vector<1x4x8xf32> to vector<4x8xf32>
    %cst_58 = arith.constant dense<0.000000e+00> : vector<4x16xf32>
    %86 = tpu.matmul %85, %82, %cst_58 {dimension_numbers = #tpu.dot_dimension_numbers<[1], [0], [0], [1], [0, 0, 1, 1], [], []>} : vector<4x8xf32>, vector<8x16xf32>, vector<4x16xf32> -> vector<4x16xf32>
    %cst_59 = arith.constant dense<0.000000e+00> : vector<4x16xf32>
    %87 = tpu.matmul %85, %83, %cst_59 {dimension_numbers = #tpu.dot_dimension_numbers<[1], [0], [0], [1], [0, 0, 1, 1], [], []>} : vector<4x8xf32>, vector<8x16xf32>, vector<4x16xf32> -> vector<4x16xf32>
    %cst_60 = arith.constant dense<0.000000e+00> : vector<8x4xf32>
    %88 = tpu.matmul %81, %86, %cst_60 {dimension_numbers = #tpu.dot_dimension_numbers<[1], [1], [0], [0], [0, 0, 1, 0], [], []>} : vector<8x16xf32>, vector<4x16xf32>, vector<8x4xf32> -> vector<8x4xf32>
    %cst_61 = arith.constant 2.500000e-01 : f32
    %89 = vector.broadcast %cst_61 : f32 to vector<8x4xf32>
    %90 = arith.mulf %88, %89 : vector<8x4xf32>
    %cst_62 = arith.constant dense<0xFF800000> : vector<8xf32>
    %91 = vector.multi_reduction <maximumf>, %90, %cst_62 [1] : vector<8x4xf32> to vector<8xf32>
    %92 = vector.shape_cast %91 : vector<8xf32> to vector<8x1xf32>
    %93 = vector.broadcast %92 : vector<8x1xf32> to vector<8x4xf32>
    %94 = arith.subf %90, %93 : vector<8x4xf32>
    %95 = math.exp %94 : vector<8x4xf32>
    %cst_63 = arith.constant dense<0.000000e+00> : vector<8xf32>
    %96 = vector.multi_reduction <add>, %95, %cst_63 [1] : vector<8x4xf32> to vector<8xf32>
    %97 = vector.shape_cast %96 : vector<8xf32> to vector<8x1xf32>
    %98 = tpu.reciprocal %97 {approx = true} : vector<8x1xf32> -> vector<8x1xf32>
    %99 = vector.broadcast %98 : vector<8x1xf32> to vector<8x4xf32>
    %100 = arith.mulf %95, %99 : vector<8x4xf32>
    %cst_64 = arith.constant dense<0.000000e+00> : vector<8x16xf32>
    %101 = tpu.matmul %100, %87, %cst_64 {dimension_numbers = #tpu.dot_dimension_numbers<[1], [0], [0], [1], [0, 0, 1, 1], [], []>} : vector<8x4xf32>, vector<4x16xf32>, vector<8x16xf32> -> vector<8x16xf32>
    %102 = tpu.concatenate %80, %101 in 1 : vector<8x16xf32>, vector<8x16xf32> -> vector<8x32xf32>
    %cst_65 = arith.constant dense<0.000000e+00> : vector<8x32xf32>
    %103 = tpu.matmul %102, %13, %cst_65 {dimension_numbers = #tpu.dot_dimension_numbers<[1], [0], [0], [1], [0, 0, 1, 1], [], []>} : vector<8x32xf32>, vector<32x32xf32>, vector<8x32xf32> -> vector<8x32xf32>
    %104 = vector.broadcast %15 : vector<1x32xf32> to vector<8x32xf32>
    %105 = arith.addf %103, %104 : vector<8x32xf32>
    %106 = arith.addf %105, %1 : vector<8x32xf32>
    %cst_66 = arith.constant dense<0.000000e+00> : vector<8xf32>
    %107 = vector.multi_reduction <add>, %106, %cst_66 [1] : vector<8x32xf32> to vector<8xf32>
    %108 = vector.shape_cast %107 : vector<8xf32> to vector<8x1xf32>
    %cst_67 = arith.constant 3.200000e+01 : f32
    %109 = vector.broadcast %cst_67 : f32 to vector<8x1xf32>
    %110 = arith.divf %108, %109 : vector<8x1xf32>
    %111 = vector.broadcast %110 : vector<8x1xf32> to vector<8x32xf32>
    %112 = arith.subf %106, %111 : vector<8x32xf32>
    %113 = arith.mulf %112, %112 : vector<8x32xf32>
    %cst_68 = arith.constant dense<0.000000e+00> : vector<8xf32>
    %114 = vector.multi_reduction <add>, %113, %cst_68 [1] : vector<8x32xf32> to vector<8xf32>
    %115 = vector.shape_cast %114 : vector<8xf32> to vector<8x1xf32>
    %cst_69 = arith.constant 3.200000e+01 : f32
    %116 = vector.broadcast %cst_69 : f32 to vector<8x1xf32>
    %117 = arith.divf %115, %116 : vector<8x1xf32>
    %118 = vector.broadcast %110 : vector<8x1xf32> to vector<8x32xf32>
    %119 = arith.subf %106, %118 : vector<8x32xf32>
    %cst_70 = arith.constant 9.99999974E-6 : f32
    %120 = vector.broadcast %cst_70 : f32 to vector<8x1xf32>
    %121 = arith.addf %117, %120 : vector<8x1xf32>
    %122 = math.rsqrt %121 : vector<8x1xf32>
    %123 = vector.broadcast %122 : vector<8x1xf32> to vector<8x32xf32>
    %124 = arith.mulf %119, %123 : vector<8x32xf32>
    %125 = vector.broadcast %17 : vector<1x32xf32> to vector<8x32xf32>
    %126 = arith.mulf %124, %125 : vector<8x32xf32>
    %127 = vector.broadcast %19 : vector<1x32xf32> to vector<8x32xf32>
    %128 = arith.addf %126, %127 : vector<8x32xf32>
    %cst_71 = arith.constant dense<0.000000e+00> : vector<8x64xf32>
    %129 = tpu.matmul %128, %21, %cst_71 {dimension_numbers = #tpu.dot_dimension_numbers<[1], [0], [0], [1], [0, 0, 1, 1], [], []>} : vector<8x32xf32>, vector<32x64xf32>, vector<8x64xf32> -> vector<8x64xf32>
    %130 = vector.broadcast %23 : vector<1x64xf32> to vector<8x64xf32>
    %131 = arith.addf %129, %130 : vector<8x64xf32>
    %cst_72 = arith.constant 5.000000e-01 : f32
    %132 = vector.broadcast %cst_72 : f32 to vector<8x64xf32>
    %133 = arith.mulf %132, %131 : vector<8x64xf32>
    %cst_73 = arith.constant 0.707106769 : f32
    %134 = vector.broadcast %cst_73 : f32 to vector<8x64xf32>
    %135 = arith.mulf %131, %134 : vector<8x64xf32>
    %136 = math.erf %135 : vector<8x64xf32>
    %cst_74 = arith.constant 1.000000e+00 : f32
    %137 = vector.broadcast %cst_74 : f32 to vector<8x64xf32>
    %138 = arith.addf %137, %136 : vector<8x64xf32>
    %139 = arith.mulf %133, %138 : vector<8x64xf32>
    %cst_75 = arith.constant dense<0.000000e+00> : vector<8x32xf32>
    %140 = tpu.matmul %139, %25, %cst_75 {dimension_numbers = #tpu.dot_dimension_numbers<[1], [0], [0], [1], [0, 0, 1, 1], [], []>} : vector<8x64xf32>, vector<64x32xf32>, vector<8x32xf32> -> vector<8x32xf32>
    %141 = vector.broadcast %27 : vector<1x32xf32> to vector<8x32xf32>
    %142 = arith.addf %140, %141 : vector<8x32xf32>
    %143 = arith.addf %106, %142 : vector<8x32xf32>
    %c1_76 = arith.constant 1 : index
    %c0_77 = arith.constant 0 : index
    %c0_78 = arith.constant 0 : index
    %144 = vector.load %arg3[%c1_76, %c0_77, %c0_78] : memref<2x1x32xf32, #tpu.memory_space<vmem>>, vector<1x1x32xf32>
    %145 = vector.shape_cast %144 : vector<1x1x32xf32> to vector<1x32xf32>
    %c1_79 = arith.constant 1 : index
    %c0_80 = arith.constant 0 : index
    %c0_81 = arith.constant 0 : index
    %146 = vector.load %arg4[%c1_79, %c0_80, %c0_81] : memref<2x1x32xf32, #tpu.memory_space<vmem>>, vector<1x1x32xf32>
    %147 = vector.shape_cast %146 : vector<1x1x32xf32> to vector<1x32xf32>
    %c1_82 = arith.constant 1 : index
    %c0_83 = arith.constant 0 : index
    %c0_84 = arith.constant 0 : index
    %148 = vector.load %arg5[%c1_82, %c0_83, %c0_84] : memref<2x32x96xf32, #tpu.memory_space<vmem>>, vector<1x32x96xf32>
    %149 = vector.shape_cast %148 : vector<1x32x96xf32> to vector<32x96xf32>
    %c1_85 = arith.constant 1 : index
    %c0_86 = arith.constant 0 : index
    %c0_87 = arith.constant 0 : index
    %150 = vector.load %arg6[%c1_85, %c0_86, %c0_87] : memref<2x1x96xf32, #tpu.memory_space<vmem>>, vector<1x1x96xf32>
    %151 = vector.shape_cast %150 : vector<1x1x96xf32> to vector<1x96xf32>
    %c1_88 = arith.constant 1 : index
    %c0_89 = arith.constant 0 : index
    %c0_90 = arith.constant 0 : index
    %152 = vector.load %arg8[%c1_88, %c0_89, %c0_90] : memref<2x32x32xf32, #tpu.memory_space<vmem>>, vector<1x32x32xf32>
    %153 = vector.shape_cast %152 : vector<1x32x32xf32> to vector<32x32xf32>
    %c1_91 = arith.constant 1 : index
    %c0_92 = arith.constant 0 : index
    %c0_93 = arith.constant 0 : index
    %154 = vector.load %arg9[%c1_91, %c0_92, %c0_93] : memref<2x1x32xf32, #tpu.memory_space<vmem>>, vector<1x1x32xf32>
    %155 = vector.shape_cast %154 : vector<1x1x32xf32> to vector<1x32xf32>
    %c1_94 = arith.constant 1 : index
    %c0_95 = arith.constant 0 : index
    %c0_96 = arith.constant 0 : index
    %156 = vector.load %arg10[%c1_94, %c0_95, %c0_96] : memref<2x1x32xf32, #tpu.memory_space<vmem>>, vector<1x1x32xf32>
    %157 = vector.shape_cast %156 : vector<1x1x32xf32> to vector<1x32xf32>
    %c1_97 = arith.constant 1 : index
    %c0_98 = arith.constant 0 : index
    %c0_99 = arith.constant 0 : index
    %158 = vector.load %arg11[%c1_97, %c0_98, %c0_99] : memref<2x1x32xf32, #tpu.memory_space<vmem>>, vector<1x1x32xf32>
    %159 = vector.shape_cast %158 : vector<1x1x32xf32> to vector<1x32xf32>
    %c1_100 = arith.constant 1 : index
    %c0_101 = arith.constant 0 : index
    %c0_102 = arith.constant 0 : index
    %160 = vector.load %arg12[%c1_100, %c0_101, %c0_102] : memref<2x32x64xf32, #tpu.memory_space<vmem>>, vector<1x32x64xf32>
    %161 = vector.shape_cast %160 : vector<1x32x64xf32> to vector<32x64xf32>
    %c1_103 = arith.constant 1 : index
    %c0_104 = arith.constant 0 : index
    %c0_105 = arith.constant 0 : index
    %162 = vector.load %arg13[%c1_103, %c0_104, %c0_105] : memref<2x1x64xf32, #tpu.memory_space<vmem>>, vector<1x1x64xf32>
    %163 = vector.shape_cast %162 : vector<1x1x64xf32> to vector<1x64xf32>
    %c1_106 = arith.constant 1 : index
    %c0_107 = arith.constant 0 : index
    %c0_108 = arith.constant 0 : index
    %164 = vector.load %arg14[%c1_106, %c0_107, %c0_108] : memref<2x64x32xf32, #tpu.memory_space<vmem>>, vector<1x64x32xf32>
    %165 = vector.shape_cast %164 : vector<1x64x32xf32> to vector<64x32xf32>
    %c1_109 = arith.constant 1 : index
    %c0_110 = arith.constant 0 : index
    %c0_111 = arith.constant 0 : index
    %166 = vector.load %arg15[%c1_109, %c0_110, %c0_111] : memref<2x1x32xf32, #tpu.memory_space<vmem>>, vector<1x1x32xf32>
    %167 = vector.shape_cast %166 : vector<1x1x32xf32> to vector<1x32xf32>
    %cst_112 = arith.constant dense<0.000000e+00> : vector<8xf32>
    %168 = vector.multi_reduction <add>, %143, %cst_112 [1] : vector<8x32xf32> to vector<8xf32>
    %169 = vector.shape_cast %168 : vector<8xf32> to vector<8x1xf32>
    %cst_113 = arith.constant 3.200000e+01 : f32
    %170 = vector.broadcast %cst_113 : f32 to vector<8x1xf32>
    %171 = arith.divf %169, %170 : vector<8x1xf32>
    %172 = vector.broadcast %171 : vector<8x1xf32> to vector<8x32xf32>
    %173 = arith.subf %143, %172 : vector<8x32xf32>
    %174 = arith.mulf %173, %173 : vector<8x32xf32>
    %cst_114 = arith.constant dense<0.000000e+00> : vector<8xf32>
    %175 = vector.multi_reduction <add>, %174, %cst_114 [1] : vector<8x32xf32> to vector<8xf32>
    %176 = vector.shape_cast %175 : vector<8xf32> to vector<8x1xf32>
    %cst_115 = arith.constant 3.200000e+01 : f32
    %177 = vector.broadcast %cst_115 : f32 to vector<8x1xf32>
    %178 = arith.divf %176, %177 : vector<8x1xf32>
    %179 = vector.broadcast %171 : vector<8x1xf32> to vector<8x32xf32>
    %180 = arith.subf %143, %179 : vector<8x32xf32>
    %cst_116 = arith.constant 9.99999974E-6 : f32
    %181 = vector.broadcast %cst_116 : f32 to vector<8x1xf32>
    %182 = arith.addf %178, %181 : vector<8x1xf32>
    %183 = math.rsqrt %182 : vector<8x1xf32>
    %184 = vector.broadcast %183 : vector<8x1xf32> to vector<8x32xf32>
    %185 = arith.mulf %180, %184 : vector<8x32xf32>
    %186 = vector.broadcast %145 : vector<1x32xf32> to vector<8x32xf32>
    %187 = arith.mulf %185, %186 : vector<8x32xf32>
    %188 = vector.broadcast %147 : vector<1x32xf32> to vector<8x32xf32>
    %189 = arith.addf %187, %188 : vector<8x32xf32>
    %cst_117 = arith.constant dense<0.000000e+00> : vector<8x96xf32>
    %190 = tpu.matmul %189, %149, %cst_117 {dimension_numbers = #tpu.dot_dimension_numbers<[1], [0], [0], [1], [0, 0, 1, 1], [], []>} : vector<8x32xf32>, vector<32x96xf32>, vector<8x96xf32> -> vector<8x96xf32>
    %191 = vector.broadcast %151 : vector<1x96xf32> to vector<8x96xf32>
    %192 = arith.addf %190, %191 : vector<8x96xf32>
    %193 = vector.extract_strided_slice %192 {offsets = [0, 0], sizes = [8, 32], strides = [1, 1]} : vector<8x96xf32> to vector<8x32xf32>
    %194 = vector.extract_strided_slice %192 {offsets = [0, 32], sizes = [8, 32], strides = [1, 1]} : vector<8x96xf32> to vector<8x32xf32>
    %195 = vector.broadcast %3 : vector<8x1xf32> to vector<8x32xf32>
    %196 = arith.mulf %194, %195 : vector<8x32xf32>
    %197 = vector.extract_strided_slice %192 {offsets = [0, 64], sizes = [8, 32], strides = [1, 1]} : vector<8x96xf32> to vector<8x32xf32>
    %198 = vector.broadcast %3 : vector<8x1xf32> to vector<8x32xf32>
    %199 = arith.mulf %197, %198 : vector<8x32xf32>
    %200 = vector.extract_strided_slice %193 {offsets = [0, 0], sizes = [8, 16], strides = [1, 1]} : vector<8x32xf32> to vector<8x16xf32>
    %201 = vector.extract_strided_slice %196 {offsets = [0, 0], sizes = [8, 16], strides = [1, 1]} : vector<8x32xf32> to vector<8x16xf32>
    %202 = vector.extract_strided_slice %199 {offsets = [0, 0], sizes = [8, 16], strides = [1, 1]} : vector<8x32xf32> to vector<8x16xf32>
    %c2 = arith.constant 2 : index
    %c0_118 = arith.constant 0 : index
    %c0_119 = arith.constant 0 : index
    %203 = vector.load %arg7[%c2, %c0_118, %c0_119] : memref<4x4x8xf32, #tpu.memory_space<vmem>>, vector<1x4x8xf32>
    %204 = vector.shape_cast %203 : vector<1x4x8xf32> to vector<4x8xf32>
    %cst_120 = arith.constant dense<0.000000e+00> : vector<4x16xf32>
    %205 = tpu.matmul %204, %201, %cst_120 {dimension_numbers = #tpu.dot_dimension_numbers<[1], [0], [0], [1], [0, 0, 1, 1], [], []>} : vector<4x8xf32>, vector<8x16xf32>, vector<4x16xf32> -> vector<4x16xf32>
    %cst_121 = arith.constant dense<0.000000e+00> : vector<4x16xf32>
    %206 = tpu.matmul %204, %202, %cst_121 {dimension_numbers = #tpu.dot_dimension_numbers<[1], [0], [0], [1], [0, 0, 1, 1], [], []>} : vector<4x8xf32>, vector<8x16xf32>, vector<4x16xf32> -> vector<4x16xf32>
    %cst_122 = arith.constant dense<0.000000e+00> : vector<8x4xf32>
    %207 = tpu.matmul %200, %205, %cst_122 {dimension_numbers = #tpu.dot_dimension_numbers<[1], [1], [0], [0], [0, 0, 1, 0], [], []>} : vector<8x16xf32>, vector<4x16xf32>, vector<8x4xf32> -> vector<8x4xf32>
    %cst_123 = arith.constant 2.500000e-01 : f32
    %208 = vector.broadcast %cst_123 : f32 to vector<8x4xf32>
    %209 = arith.mulf %207, %208 : vector<8x4xf32>
    %cst_124 = arith.constant dense<0xFF800000> : vector<8xf32>
    %210 = vector.multi_reduction <maximumf>, %209, %cst_124 [1] : vector<8x4xf32> to vector<8xf32>
    %211 = vector.shape_cast %210 : vector<8xf32> to vector<8x1xf32>
    %212 = vector.broadcast %211 : vector<8x1xf32> to vector<8x4xf32>
    %213 = arith.subf %209, %212 : vector<8x4xf32>
    %214 = math.exp %213 : vector<8x4xf32>
    %cst_125 = arith.constant dense<0.000000e+00> : vector<8xf32>
    %215 = vector.multi_reduction <add>, %214, %cst_125 [1] : vector<8x4xf32> to vector<8xf32>
    %216 = vector.shape_cast %215 : vector<8xf32> to vector<8x1xf32>
    %217 = tpu.reciprocal %216 {approx = true} : vector<8x1xf32> -> vector<8x1xf32>
    %218 = vector.broadcast %217 : vector<8x1xf32> to vector<8x4xf32>
    %219 = arith.mulf %214, %218 : vector<8x4xf32>
    %cst_126 = arith.constant dense<0.000000e+00> : vector<8x16xf32>
    %220 = tpu.matmul %219, %206, %cst_126 {dimension_numbers = #tpu.dot_dimension_numbers<[1], [0], [0], [1], [0, 0, 1, 1], [], []>} : vector<8x4xf32>, vector<4x16xf32>, vector<8x16xf32> -> vector<8x16xf32>
    %221 = vector.extract_strided_slice %193 {offsets = [0, 16], sizes = [8, 16], strides = [1, 1]} : vector<8x32xf32> to vector<8x16xf32>
    %222 = vector.extract_strided_slice %196 {offsets = [0, 16], sizes = [8, 16], strides = [1, 1]} : vector<8x32xf32> to vector<8x16xf32>
    %223 = vector.extract_strided_slice %199 {offsets = [0, 16], sizes = [8, 16], strides = [1, 1]} : vector<8x32xf32> to vector<8x16xf32>
    %c3 = arith.constant 3 : index
    %c0_127 = arith.constant 0 : index
    %c0_128 = arith.constant 0 : index
    %224 = vector.load %arg7[%c3, %c0_127, %c0_128] : memref<4x4x8xf32, #tpu.memory_space<vmem>>, vector<1x4x8xf32>
    %225 = vector.shape_cast %224 : vector<1x4x8xf32> to vector<4x8xf32>
    %cst_129 = arith.constant dense<0.000000e+00> : vector<4x16xf32>
    %226 = tpu.matmul %225, %222, %cst_129 {dimension_numbers = #tpu.dot_dimension_numbers<[1], [0], [0], [1], [0, 0, 1, 1], [], []>} : vector<4x8xf32>, vector<8x16xf32>, vector<4x16xf32> -> vector<4x16xf32>
    %cst_130 = arith.constant dense<0.000000e+00> : vector<4x16xf32>
    %227 = tpu.matmul %225, %223, %cst_130 {dimension_numbers = #tpu.dot_dimension_numbers<[1], [0], [0], [1], [0, 0, 1, 1], [], []>} : vector<4x8xf32>, vector<8x16xf32>, vector<4x16xf32> -> vector<4x16xf32>
    %cst_131 = arith.constant dense<0.000000e+00> : vector<8x4xf32>
    %228 = tpu.matmul %221, %226, %cst_131 {dimension_numbers = #tpu.dot_dimension_numbers<[1], [1], [0], [0], [0, 0, 1, 0], [], []>} : vector<8x16xf32>, vector<4x16xf32>, vector<8x4xf32> -> vector<8x4xf32>
    %cst_132 = arith.constant 2.500000e-01 : f32
    %229 = vector.broadcast %cst_132 : f32 to vector<8x4xf32>
    %230 = arith.mulf %228, %229 : vector<8x4xf32>
    %cst_133 = arith.constant dense<0xFF800000> : vector<8xf32>
    %231 = vector.multi_reduction <maximumf>, %230, %cst_133 [1] : vector<8x4xf32> to vector<8xf32>
    %232 = vector.shape_cast %231 : vector<8xf32> to vector<8x1xf32>
    %233 = vector.broadcast %232 : vector<8x1xf32> to vector<8x4xf32>
    %234 = arith.subf %230, %233 : vector<8x4xf32>
    %235 = math.exp %234 : vector<8x4xf32>
    %cst_134 = arith.constant dense<0.000000e+00> : vector<8xf32>
    %236 = vector.multi_reduction <add>, %235, %cst_134 [1] : vector<8x4xf32> to vector<8xf32>
    %237 = vector.shape_cast %236 : vector<8xf32> to vector<8x1xf32>
    %238 = tpu.reciprocal %237 {approx = true} : vector<8x1xf32> -> vector<8x1xf32>
    %239 = vector.broadcast %238 : vector<8x1xf32> to vector<8x4xf32>
    %240 = arith.mulf %235, %239 : vector<8x4xf32>
    %cst_135 = arith.constant dense<0.000000e+00> : vector<8x16xf32>
    %241 = tpu.matmul %240, %227, %cst_135 {dimension_numbers = #tpu.dot_dimension_numbers<[1], [0], [0], [1], [0, 0, 1, 1], [], []>} : vector<8x4xf32>, vector<4x16xf32>, vector<8x16xf32> -> vector<8x16xf32>
    %242 = tpu.concatenate %220, %241 in 1 : vector<8x16xf32>, vector<8x16xf32> -> vector<8x32xf32>
    %cst_136 = arith.constant dense<0.000000e+00> : vector<8x32xf32>
    %243 = tpu.matmul %242, %153, %cst_136 {dimension_numbers = #tpu.dot_dimension_numbers<[1], [0], [0], [1], [0, 0, 1, 1], [], []>} : vector<8x32xf32>, vector<32x32xf32>, vector<8x32xf32> -> vector<8x32xf32>
    %244 = vector.broadcast %155 : vector<1x32xf32> to vector<8x32xf32>
    %245 = arith.addf %243, %244 : vector<8x32xf32>
    %246 = arith.addf %245, %143 : vector<8x32xf32>
    %cst_137 = arith.constant dense<0.000000e+00> : vector<8xf32>
    %247 = vector.multi_reduction <add>, %246, %cst_137 [1] : vector<8x32xf32> to vector<8xf32>
    %248 = vector.shape_cast %247 : vector<8xf32> to vector<8x1xf32>
    %cst_138 = arith.constant 3.200000e+01 : f32
    %249 = vector.broadcast %cst_138 : f32 to vector<8x1xf32>
    %250 = arith.divf %248, %249 : vector<8x1xf32>
    %251 = vector.broadcast %250 : vector<8x1xf32> to vector<8x32xf32>
    %252 = arith.subf %246, %251 : vector<8x32xf32>
    %253 = arith.mulf %252, %252 : vector<8x32xf32>
    %cst_139 = arith.constant dense<0.000000e+00> : vector<8xf32>
    %254 = vector.multi_reduction <add>, %253, %cst_139 [1] : vector<8x32xf32> to vector<8xf32>
    %255 = vector.shape_cast %254 : vector<8xf32> to vector<8x1xf32>
    %cst_140 = arith.constant 3.200000e+01 : f32
    %256 = vector.broadcast %cst_140 : f32 to vector<8x1xf32>
    %257 = arith.divf %255, %256 : vector<8x1xf32>
    %258 = vector.broadcast %250 : vector<8x1xf32> to vector<8x32xf32>
    %259 = arith.subf %246, %258 : vector<8x32xf32>
    %cst_141 = arith.constant 9.99999974E-6 : f32
    %260 = vector.broadcast %cst_141 : f32 to vector<8x1xf32>
    %261 = arith.addf %257, %260 : vector<8x1xf32>
    %262 = math.rsqrt %261 : vector<8x1xf32>
    %263 = vector.broadcast %262 : vector<8x1xf32> to vector<8x32xf32>
    %264 = arith.mulf %259, %263 : vector<8x32xf32>
    %265 = vector.broadcast %157 : vector<1x32xf32> to vector<8x32xf32>
    %266 = arith.mulf %264, %265 : vector<8x32xf32>
    %267 = vector.broadcast %159 : vector<1x32xf32> to vector<8x32xf32>
    %268 = arith.addf %266, %267 : vector<8x32xf32>
    %cst_142 = arith.constant dense<0.000000e+00> : vector<8x64xf32>
    %269 = tpu.matmul %268, %161, %cst_142 {dimension_numbers = #tpu.dot_dimension_numbers<[1], [0], [0], [1], [0, 0, 1, 1], [], []>} : vector<8x32xf32>, vector<32x64xf32>, vector<8x64xf32> -> vector<8x64xf32>
    %270 = vector.broadcast %163 : vector<1x64xf32> to vector<8x64xf32>
    %271 = arith.addf %269, %270 : vector<8x64xf32>
    %cst_143 = arith.constant 5.000000e-01 : f32
    %272 = vector.broadcast %cst_143 : f32 to vector<8x64xf32>
    %273 = arith.mulf %272, %271 : vector<8x64xf32>
    %cst_144 = arith.constant 0.707106769 : f32
    %274 = vector.broadcast %cst_144 : f32 to vector<8x64xf32>
    %275 = arith.mulf %271, %274 : vector<8x64xf32>
    %276 = math.erf %275 : vector<8x64xf32>
    %cst_145 = arith.constant 1.000000e+00 : f32
    %277 = vector.broadcast %cst_145 : f32 to vector<8x64xf32>
    %278 = arith.addf %277, %276 : vector<8x64xf32>
    %279 = arith.mulf %273, %278 : vector<8x64xf32>
    %cst_146 = arith.constant dense<0.000000e+00> : vector<8x32xf32>
    %280 = tpu.matmul %279, %165, %cst_146 {dimension_numbers = #tpu.dot_dimension_numbers<[1], [0], [0], [1], [0, 0, 1, 1], [], []>} : vector<8x64xf32>, vector<64x32xf32>, vector<8x32xf32> -> vector<8x32xf32>
    %281 = vector.broadcast %167 : vector<1x32xf32> to vector<8x32xf32>
    %282 = arith.addf %280, %281 : vector<8x32xf32>
    %283 = arith.addf %246, %282 : vector<8x32xf32>
    %c0_147 = arith.constant 0 : index
    %c0_148 = arith.constant 0 : index
    %284 = vector.load %arg16[%c0_147, %c0_148] : memref<1x32xf32, #tpu.memory_space<vmem>>, vector<1x32xf32>
    %c0_149 = arith.constant 0 : index
    %c0_150 = arith.constant 0 : index
    %285 = vector.load %arg17[%c0_149, %c0_150] : memref<1x32xf32, #tpu.memory_space<vmem>>, vector<1x32xf32>
    %cst_151 = arith.constant dense<0.000000e+00> : vector<8xf32>
    %286 = vector.multi_reduction <add>, %283, %cst_151 [1] : vector<8x32xf32> to vector<8xf32>
    %287 = vector.shape_cast %286 : vector<8xf32> to vector<8x1xf32>
    %cst_152 = arith.constant 3.200000e+01 : f32
    %288 = vector.broadcast %cst_152 : f32 to vector<8x1xf32>
    %289 = arith.divf %287, %288 : vector<8x1xf32>
    %290 = vector.broadcast %289 : vector<8x1xf32> to vector<8x32xf32>
    %291 = arith.subf %283, %290 : vector<8x32xf32>
    %292 = arith.mulf %291, %291 : vector<8x32xf32>
    %cst_153 = arith.constant dense<0.000000e+00> : vector<8xf32>
    %293 = vector.multi_reduction <add>, %292, %cst_153 [1] : vector<8x32xf32> to vector<8xf32>
    %294 = vector.shape_cast %293 : vector<8xf32> to vector<8x1xf32>
    %cst_154 = arith.constant 3.200000e+01 : f32
    %295 = vector.broadcast %cst_154 : f32 to vector<8x1xf32>
    %296 = arith.divf %294, %295 : vector<8x1xf32>
    %297 = vector.broadcast %289 : vector<8x1xf32> to vector<8x32xf32>
    %298 = arith.subf %283, %297 : vector<8x32xf32>
    %cst_155 = arith.constant 9.99999974E-6 : f32
    %299 = vector.broadcast %cst_155 : f32 to vector<8x1xf32>
    %300 = arith.addf %296, %299 : vector<8x1xf32>
    %301 = math.rsqrt %300 : vector<8x1xf32>
    %302 = vector.broadcast %301 : vector<8x1xf32> to vector<8x32xf32>
    %303 = arith.mulf %298, %302 : vector<8x32xf32>
    %304 = vector.broadcast %284 : vector<1x32xf32> to vector<8x32xf32>
    %305 = arith.mulf %303, %304 : vector<8x32xf32>
    %306 = vector.broadcast %285 : vector<1x32xf32> to vector<8x32xf32>
    %307 = arith.addf %305, %306 : vector<8x32xf32>
    %308 = vector.broadcast %3 : vector<8x1xf32> to vector<8x32xf32>
    %309 = arith.mulf %307, %308 : vector<8x32xf32>
    %c0_156 = arith.constant 0 : index
    %c0_157 = arith.constant 0 : index
    %c0_158 = arith.constant 0 : index
    %310 = vector.load %arg18[%c0_156, %c0_157, %c0_158] : memref<1x8x32xf32, #tpu.memory_space<vmem>>, vector<1x8x32xf32>
    %311 = vector.shape_cast %310 : vector<1x8x32xf32> to vector<8x32xf32>
    %312 = vector.shape_cast %309 : vector<8x32xf32> to vector<1x8x32xf32>
    tpu.vector_store %arg18[%c0_156, %c0_157, %c0_158], %312 {strides = array<i32>} : memref<1x8x32xf32, #tpu.memory_space<vmem>>, vector<1x8x32xf32>,
    return
  }
  func.func @transform_0(%arg0: i32) -> (i32, i32, i32) {
    %c0_i32 = arith.constant 0 : i32
    %c0_i32_0 = arith.constant 0 : i32
    %c0_i32_1 = arith.constant 0 : i32
    return %arg0, %c0_i32, %c0_i32_0 : i32, i32, i32
  }
  func.func @transform_1(%arg0: i32) -> (i32, i32, i32) {
    %c0_i32 = arith.constant 0 : i32
    %c0_i32_0 = arith.constant 0 : i32
    %c0_i32_1 = arith.constant 0 : i32
    return %arg0, %c0_i32, %c0_i32_0 : i32, i32, i32
  }
  func.func @transform_2(%arg0: i32) -> (i32, i32, i32) {
    %c0_i32 = arith.constant 0 : i32
    %c0_i32_0 = arith.constant 0 : i32
    %c0_i32_1 = arith.constant 0 : i32
    %c0_i32_2 = arith.constant 0 : i32
    return %c0_i32, %c0_i32_0, %c0_i32_1 : i32, i32, i32
  }
  func.func @transform_3(%arg0: i32) -> (i32, i32, i32) {
    %c0_i32 = arith.constant 0 : i32
    %c0_i32_0 = arith.constant 0 : i32
    %c0_i32_1 = arith.constant 0 : i32
    %c0_i32_2 = arith.constant 0 : i32
    return %c0_i32, %c0_i32_0, %c0_i32_1 : i32, i32, i32
  }
  func.func @transform_4(%arg0: i32) -> (i32, i32, i32) {
    %c0_i32 = arith.constant 0 : i32
    %c0_i32_0 = arith.constant 0 : i32
    %c0_i32_1 = arith.constant 0 : i32
    %c0_i32_2 = arith.constant 0 : i32
    return %c0_i32, %c0_i32_0, %c0_i32_1 : i32, i32, i32
  }
  func.func @transform_5(%arg0: i32) -> (i32, i32, i32) {
    %c0_i32 = arith.constant 0 : i32
    %c0_i32_0 = arith.constant 0 : i32
    %c0_i32_1 = arith.constant 0 : i32
    %c0_i32_2 = arith.constant 0 : i32
    return %c0_i32, %c0_i32_0, %c0_i32_1 : i32, i32, i32
  }
  func.func @transform_6(%arg0: i32) -> (i32, i32, i32) {
    %c0_i32 = arith.constant 0 : i32
    %c0_i32_0 = arith.constant 0 : i32
    %c0_i32_1 = arith.constant 0 : i32
    %c0_i32_2 = arith.constant 0 : i32
    return %c0_i32, %c0_i32_0, %c0_i32_1 : i32, i32, i32
  }
  func.func @transform_7(%arg0: i32) -> (i32, i32, i32) {
    %c0_i32 = arith.constant 0 : i32
    %c0_i32_0 = arith.constant 0 : i32
    %c0_i32_1 = arith.constant 0 : i32
    %c0_i32_2 = arith.constant 0 : i32
    return %c0_i32, %c0_i32_0, %c0_i32_1 : i32, i32, i32
  }
  func.func @transform_8(%arg0: i32) -> (i32, i32, i32) {
    %c0_i32 = arith.constant 0 : i32
    %c0_i32_0 = arith.constant 0 : i32
    %c0_i32_1 = arith.constant 0 : i32
    %c0_i32_2 = arith.constant 0 : i32
    return %c0_i32, %c0_i32_0, %c0_i32_1 : i32, i32, i32
  }
  func.func @transform_9(%arg0: i32) -> (i32, i32, i32) {
    %c0_i32 = arith.constant 0 : i32
    %c0_i32_0 = arith.constant 0 : i32
    %c0_i32_1 = arith.constant 0 : i32
    %c0_i32_2 = arith.constant 0 : i32
    return %c0_i32, %c0_i32_0, %c0_i32_1 : i32, i32, i32
  }
  func.func @transform_10(%arg0: i32) -> (i32, i32, i32) {
    %c0_i32 = arith.constant 0 : i32
    %c0_i32_0 = arith.constant 0 : i32
    %c0_i32_1 = arith.constant 0 : i32
    %c0_i32_2 = arith.constant 0 : i32
    return %c0_i32, %c0_i32_0, %c0_i32_1 : i32, i32, i32
  }
  func.func @transform_11(%arg0: i32) -> (i32, i32, i32) {
    %c0_i32 = arith.constant 0 : i32
    %c0_i32_0 = arith.constant 0 : i32
    %c0_i32_1 = arith.constant 0 : i32
    %c0_i32_2 = arith.constant 0 : i32
    return %c0_i32, %c0_i32_0, %c0_i32_1 : i32, i32, i32
  }
  func.func @transform_12(%arg0: i32) -> (i32, i32, i32) {
    %c0_i32 = arith.constant 0 : i32
    %c0_i32_0 = arith.constant 0 : i32
    %c0_i32_1 = arith.constant 0 : i32
    %c0_i32_2 = arith.constant 0 : i32
    return %c0_i32, %c0_i32_0, %c0_i32_1 : i32, i32, i32
  }
  func.func @transform_13(%arg0: i32) -> (i32, i32, i32) {
    %c0_i32 = arith.constant 0 : i32
    %c0_i32_0 = arith.constant 0 : i32
    %c0_i32_1 = arith.constant 0 : i32
    %c0_i32_2 = arith.constant 0 : i32
    return %c0_i32, %c0_i32_0, %c0_i32_1 : i32, i32, i32
  }
  func.func @transform_14(%arg0: i32) -> (i32, i32, i32) {
    %c0_i32 = arith.constant 0 : i32
    %c0_i32_0 = arith.constant 0 : i32
    %c0_i32_1 = arith.constant 0 : i32
    %c0_i32_2 = arith.constant 0 : i32
    return %c0_i32, %c0_i32_0, %c0_i32_1 : i32, i32, i32
  }
  func.func @transform_15(%arg0: i32) -> (i32, i32) {
    %c0_i32 = arith.constant 0 : i32
    %c0_i32_0 = arith.constant 0 : i32
    %c0_i32_1 = arith.constant 0 : i32
    return %c0_i32, %c0_i32_0 : i32, i32
  }
  func.func @transform_16(%arg0: i32) -> (i32, i32) {
    %c0_i32 = arith.constant 0 : i32
    %c0_i32_0 = arith.constant 0 : i32
    %c0_i32_1 = arith.constant 0 : i32
    return %c0_i32, %c0_i32_0 : i32, i32
  }
  func.func @transform_17(%arg0: i32) -> (i32, i32, i32) {
    %c0_i32 = arith.constant 0 : i32
    %c0_i32_0 = arith.constant 0 : i32
    %c0_i32_1 = arith.constant 0 : i32
    return %arg0, %c0_i32, %c0_i32_0 : i32, i32, i32
  }
}

</mosaic_0001>

<bundles_post_ra>
// kernel: tpu_custom_call.1
= control target key start
LH: loop header
LB: loop body
LE: loop exit
PB: predicated region body
PF: predicated region fallthrough
CT: control target
= control target key end

     0   :  { %s3941_s0 = inlined_call_operand.vmem [shape: f32[2,8,32], index: 0, kind: input, shape index: {}]   ;;  %s3942_s1 = inlined_call_operand.vmem [shape: f32[2,8,1], index: 1, kind: input, shape index: {}]   ;;  %s3943_s2 = inlined_call_operand.vmem [shape: f32[2,1,32], index: 2, kind: input, shape index: {}]   ;;  %s3944_s3 = inlined_call_operand.vmem [shape: f32[2,1,32], index: 3, kind: input, shape index: {}]   ;;  %s3945_s4 = inlined_call_operand.vmem [shape: f32[2,32,96], index: 4, kind: input, shape index: {}]   ;;  %s3946_s5 = inlined_call_operand.vmem [shape: f32[2,1,96], index: 5, kind: input, shape index: {}]   ;;  %s3947_s6 = inlined_call_operand.hbm [shape: f32[4,4,8], index: 6, kind: input, shape index: {}]   ;;  %s3948_s7 = inlined_call_operand.vmem [shape: f32[2,32,32], index: 7, kind: input, shape index: {}]   ;;  %s3949_s8 = inlined_call_operand.vmem [shape: f32[2,1,32], index: 8, kind: input, shape index: {}]   ;;  %s3950_s9 = inlined_call_operand.vmem [shape: f32[2,1,32], index: 9, kind: input, shape index: {}]   ;;  %s3951_s10 = inlined_call_operand.vmem [shape: f32[2,1,32], index: 10, kind: input, shape index: {}]   ;;  %s3952_s11 = inlined_call_operand.vmem [shape: f32[2,32,64], index: 11, kind: input, shape index: {}]   ;;  %s3953_s12 = inlined_call_operand.vmem [shape: f32[2,1,64], index: 12, kind: input, shape index: {}]   ;;  %s3954_s13 = inlined_call_operand.vmem [shape: f32[2,64,32], index: 13, kind: input, shape index: {}]   ;;  %s3955_s14 = inlined_call_operand.vmem [shape: f32[2,1,32], index: 14, kind: input, shape index: {}]   ;;  %s3956_s15 = inlined_call_operand.vmem [shape: f32[1,32], index: 15, kind: input, shape index: {}]   ;;  %s3957_s16 = inlined_call_operand.vmem [shape: f32[1,32], index: 16, kind: input, shape index: {}]   ;;  %s3958_s17 = inlined_call_operand.hbm [shape: f32[2,8,32], index: 17, kind: output, shape index: {}]  }
   0x1   :  { %3965 = sst [smem:[#allocation10_spill]] %s3941_s0 }
   0x2   :  { %3966 = sst [smem:[#allocation11_spill]] %s3942_s1 }
   0x3   :  { %3967 = sst [smem:[#allocation12_spill]] %s3943_s2 }
   0x4   :  { %3968 = sst [smem:[#allocation13_spill]] %s3944_s3 }
   0x5   :  { %3969 = sst [smem:[#allocation14_spill]] %s3945_s4 }
   0x6   :  { %3970 = sst [smem:[#allocation15_spill]] %s3947_s6 }
   0x7   :  { %22 = vsyncpa [#allocation3], 0 }
   0x8   :  { %23 = vsyncpa [#allocation4], 0 }
   0x9   :  { %25 = vsyncpa [#allocation4 + $0x1], 0  ;;  %s3458_s24 = smov 0   ;;  %s3460_s25 = smov 0  }
   0xa   :  { %s3462_s26 = smov 0   ;;  %s3464_s27 = smov 0  }
   0xb LB: > { %3971 = sst [smem:[#allocation8_spill]] %s3349_s26  ;;  %s3479_s28 = sadd.s32 4294967295, %s3353_s27   ;;  %s3353_s27 = sphi %s3464_s27, %s3992_s27   ;;  %s3349_s26 = sphi %s3462_s26, %s3989_s26   ;;  %s3345_s25 = sphi %s3460_s25, %s3991_s25   ;;  %s3341_s24 = sphi %s3458_s24, %s3990_s24  }
   0xc   : > { %s2815_s29 = sadd.s32 4294967294, %s3353_s27   ;;  %s3483_s0 = sadd.s32 1, %s3353_s27  }
   0xd   : > { %s405_s30 = sadd.s32 1, %s3349_s26  ;;  %s402_s18 = ssub.s32 %s3353_s27, %s3483_s0 }
   0xe   : > { %p415_p0 = scmp.ne.s32.totalorder %s3349_s26, %s3345_s25  ;;  %p403_p1 = scmp.eq.s32.totalorder %s402_s18, 0 }
   0xf   : > { %p416_p2 = scmp.eq.s32.totalorder %s3479_s28, 1  ;;  %p421_p3 = scmp.ne.s32.totalorder %s3345_s25, %s3341_s24 }
  0x10   : > { %p422_p4 = scmp.eq.s32.totalorder %s2815_s29, 1  ;;  %p2816_p7 = scmp.ge.s32.totalorder %s3353_s27, 1 }
  0x11   : > { %s3494_s19 = scalar_select %p403_p1, %s3349_s26, %s405_s30  }
  0x12   : > { %p3496_p5 = por %p416_p2, %p415_p0  ;;  %p3500_p6 = por %p422_p4, %p421_p3 }
  0x13   : > { %3972 = sst [smem:[#allocation9_spill]] %s3494_s19  ;;  %p429_p8 = scmp.lt.s32.totalorder %s3353_s27, 3 }
  0x14   : > { %s3974_s20 = scalar_select %p3500_p6, 1, 0 }
  0x15   : > { %p3184_p9 = scmp.eq.s32.totalorder %s3479_s28, 0  ;;  %p3507_p10 = pnand %p2816_p7, %p429_p8 }
  0x16   : > { %s3355_s22 = smov [#allocation2]  }
  0x17   : > { %s453_s23 = sshll.u32 %s3355_s22, 4  ;;  %p3176_p11 = pneg %p3507_p10  ;;  %s454_s23 = int_to_ptr.vmem [resolvable:$true] %s453_s23 }
  0x18   : > { %s3274_s29 = scalar_lea.vmem %s454_s23, 256  ;;  %p3282_p3 = scmp.lt.s32.totalorder %s454_s23, %s454_s23 }
  0x19   : > { %p3177_p12 = pnand %p3184_p9, %p3176_p11  ;;  %p3275_p0 = scmp.ne.s32.totalorder %s454_s23, %s3274_s29 }
  0x1a   : > { %p3283_p4 = scmp.lt.s32.totalorder %s3274_s29, %s3274_s29 }
  0x1b   : > { %p3265_p13 = pneg %p3177_p12 }
  0x1c   : > { %p3284_p6 = por %p3283_p4, %p3282_p3 }
  0x1d   : > { %p3277_p1 = pnand %p3275_p0, %p3265_p13 }
  0x1f   : > { %p3278_p2 = pneg %p3277_p1 }
  0x21   : > { %p3285_p7 = pnand %p3284_p6, %p3278_p2 }
  0x23   : > { %3288 = shalt.err (!%p3285_p7)
}
  0x24   : > { %s3356_s30 = smov 64   ;;  %s3357_s18 = smov 4  }
  0x25   : > { %s3976_s6 = sld [smem:[#allocation15_spill]] }
  0x27   : > { %513 = sbr.rel (%p3507_p10) target bundleno = 5876 (0x16f4), region = 88 }
  0x2b   : > { %3179 = dma.hbm_to_vmem [thread:$0]  (!%p3177_p12), %s3976_s6, 256, %s454_s23, [#allocation3], %s3356_s30, %s3356_s30, %s3357_s18  }
  0x2c   : > { %3332 = dma.done.wait (%p3184_p9), [#allocation3], 256  }
  0x2d   : > { %3334 = vsyncadd (%p3184_p9), [#allocation3], 4294967040  ;;  %p568_p8 = scmp.lt.s32.totalorder %s3479_s28, 1  ;;  %s3977_s23 = sld [smem:[#allocation10_spill]]  ;;  %vm606_vm0 = vcmask 261120   ;;  %v3358_v8 = vmov 0.0  }
  0x2e   : > { %s3978_s4 = sld [smem:[#allocation14_spill]]  ;;  %2986 = vmatprep.subr.mxu0 %v3358_v8  ;;  %vm3359_vm1 = vmmov 0   ;;  %2997 = vmatprep.subr.mxu1 %v3358_v8  ;;  %v3360_v12 = vmov 0   ;;  %v2826_v23 = vld [vmem:[%s3946_s5] ss:$0 sm:$0xff]  ;;  %s3962_s6 = smov 64  }
  0x2f   : > { %s3526_s22 = scalar_select %p568_p8, %s3479_s28, 1  ;;  %2994 = vmatprep.mubr.msk.f32.mxu0 %vm3359_vm1, %v3358_v8  ;;  %2999 = vmatprep.mubr.msk.f32.mxu1 %vm3359_vm1, %v3358_v8  ;;  %v720_v29 = vld [vmem:[#allocation2] sm:$0xf]  ;;  %vm725_vm2 = vcmask 64512   ;;  %vm872_vm3 = vcmask 130048   ;;  %vm965_vm4 = vcmask 1043456  }
  0x30   : > { %3231 = vset.pattern.permute.xlu1 %v3360_v12  ;;  %3232 = vset.pattern.permute.xlu0 %v3360_v12  ;;  %s3980_s2 = sld [smem:[#allocation12_spill]]  ;;  %s3964_s19 = smov 96   ;;  %v1040_v36 = vld [vmem:[#allocation2 + $0x4] sm:$0xf]  ;;  %vm950_vm5 = vcmask 31744   ;;  %vm1557_vm6 = vcmask 523264  }
  0x31   : > { %s2822_s29 = sshll.u32 %s3526_s22, 3  ;;  %s3981_s3 = sld [smem:[#allocation13_spill]] }
  0x32   : > { %s3960_s30 = smov 48   ;;  %s3963_s22 = smov 16  }
  0x33   : > { %s571_s21 = scalar_lea.vmem %s3977_s23, %s2822_s29  ;;  %s3979_s23 = sld [smem:[#allocation11_spill]] }
  0x34   : > { %v3534_v0 = vld [vmem:[%s571_s21] sm:$0xff]  ;;  %v583_v7 = vld [vmem:[%s3978_s4 + $0x18] sm:$0xff]  ;;  %v582_v9 = vld [vmem:[%s3978_s4 + $0x10] sm:$0xff]  ;;  %s3367_s18 = smov [#allocation5]  }
  0x35   : > { %v607_v1 = vsel %vm606_vm0, %v3534_v0, 0.0  ;;  %2987 = vmatpush3.msra.mxu0 %v583_v7  ;;  %v581_v10 = vld [vmem:[%s3978_s4 + $0x8] sm:$0xff]  ;;  %v580_v11 = vld [vmem:[%s3978_s4] sm:$0xff]  ;;  %v588_v7 = vld [vmem:[%s3948_s7 + $0x18] sm:$0xff] }
  0x36   : > { %608 = vadd.xlane.f32.xlu0 %v607_v1  ;;  %2988 = vmatprep.subr.mxu0 %v3358_v8  ;;  %v2824_v18 = vld [vmem:[%s3980_s2] ss:$0 sm:$0xff] }
  0x37   : > { %2989 = vmatpush3.msra.mxu0 %v582_v9  ;;  %v2825_v20 = vld [vmem:[%s3981_s3] ss:$0 sm:$0xff]  ;;  %v587_v9 = vld [vmem:[%s3948_s7 + $0x10] sm:$0xff] }
  0x38   : > { %2990 = vmatprep.subr.mxu0 %v3358_v8 }
  0x39   : > { %2991 = vmatpush3.msra.mxu0 %v581_v10  ;;  %s575_s21 = scalar_lea.vmem %s3979_s23, %s2822_s29  ;;  %s3363_s23 = smov 80   ;;  %v586_v10 = vld [vmem:[%s3948_s7 + $0x8] sm:$0xff] }
  0x3a   : > { %2992 = vmatprep.subr.mxu0 %v3358_v8  ;;  %v577_v13 = vld [vmem:[%s575_s21] sm:$0xff]  ;;  %s3961_s21 = smov 112  }
  0x3b   : > { %2993 = vmatpush3.msra.mxu0 %v580_v11  ;;  %716 = vperm.xlu1 %3231, %v577_v13   ;;  %v585_v11 = vld [vmem:[%s3948_s7] sm:$0xff] }
  0x3c   : > { %3012 = vmatprep.subr.mxu0 %v3358_v8 }
  0xb6   : > { %v3579_v25 = vpop.permute.xlu1 %716 }
  0xbf   : > { %v609_v2 = vpop.xlane.xlu0 %608 }
  0xc0   : > { %v611_v3 = vmul.f32 0.03125, %v609_v2 }
  0xc2   : > { %v612_v4 = vsub.f32 %v3534_v0, %v611_v3 }
  0xc4   : > { %v613_v5 = vmul.f32 %v612_v4, %v612_v4 }
  0xc6   : > { %v614_v6 = vsel %vm606_vm0, %v613_v5, 0.0 }
  0xc7   : > { %615 = vadd.xlane.f32.xlu0 %v614_v6 }
 0x150   : > { %v616_v14 = vpop.xlane.xlu0 %615 }
 0x151   : > { %v617_v15 = vmul.f32 0.03125, %v616_v14 }
 0x153   : > { %v618_v16 = vadd.f32 1e-05, %v617_v15 }
 0x155   : > { %3233 = vrsqrt.f32 %v618_v16  ;;  %v2840_v16 = vld [vmem:[%s3949_s8] ss:$0 sm:$0xff] }
 0x162   : > { %v3234_v17 = vpop.eup %3233 }
 0x163   : > { %v620_v19 = vmul.f32 %v3234_v17, %v612_v4 }
 0x165   : > { %v627_v21 = vmul.f32 %v2824_v18, %v620_v19 }
 0x167   : > { %v634_v22 = vadd.f32 %v2825_v20, %v627_v21 }
 0x169   : > { %2995 = vmatmul.mubr.msk.f32.vlgmr.msra.gmra.mxu0 %vm606_vm0, %v634_v22 }
 0x16a   : > { %3014 = vmatprep.mubr.msk.f32.mxu0 %vm3359_vm1, %v3358_v8 }
 0x229   : > { %v710_v24 = vpop.f32.mrf.mxu0 }
 0x22a   : > { %v711_v26 = vadd.f32 %v2826_v23, %v710_v24 }
 0x22b   : > { %v2996_v27 = vpop.f32.mrf.mxu0 }
 0x22c   : > { %v719_v28 = vmul.f32 %v3579_v25, %v711_v26 }
 0x22e   : > { %799 = vrot.lane.b32.xlu0 %v719_v28, %s3962_s6  ;;  %722 = vrot.lane.b32.xlu1 %v719_v28, %s3964_s19  ;;  %s3984_s6 = smov 112  }
 0x232   : > { %1041 = vrot.lane.b32.xlu1 %v719_v28, %s3363_s23 }
 0x236   : > { %1190 = vrot.lane.b32.xlu1 %v711_v26, %s3961_s21  ;;  %s3982_s21 = smov 96  }
 0x2a0   : > { %v723_v30 = vpop.permute.xlu1 %722  ;;  %v800_v31 = vpop.permute.xlu0 %799 }
 0x2a1   : > { %2998 = vmatpush3.msra.mxu1 %v723_v30  ;;  %v592_v30 = vld [vmem:[%s3952_s11] sm:$0xff] }
 0x2a2   : > { %3000 = vmatmul.mubr.msk.f32.vlgmr.msra.gmra.mxu1 %vm725_vm2, %v720_v29  ;;  %3002 = vmatprep.subr.mxu1 %v3358_v8 }
 0x2a3   : > { %3003 = vmatpush3.msra.mxu1 %v800_v31  ;;  %3004 = vmatprep.mubr.msk.f32.mxu1 %vm3359_vm1, %v3358_v8 }
 0x2a4   : > { %3007 = vmatprep.subr.mxu1 %v3358_v8  ;;  %v1042_v34 = vpop.permute.xlu1 %1041 }
 0x2a6   : > { %3005 = vmatmul.mubr.msk.f32.vlgmr.msra.gmra.mxu1 %vm725_vm2, %v720_v29  ;;  %v593_v29 = vld [vmem:[%s3952_s11 + $0x8] sm:$0xff] }
 0x2a7   : > { %3009 = vmatprep.mubr.msk.f32.mxu1 %vm3359_vm1, %v3358_v8 }
 0x2a8   : > { %v1191_v44 = vpop.permute.xlu1 %1190 }
 0x362   : > { %v795_v32 = vpop.f32.mrf.mxu1 }
 0x363   : > { %3008 = vmatpush3.xpose.msk.msra.mxu1 %vm872_vm3, %v795_v32 }
 0x364   : > { %v3001_v33 = vpop.f32.mrf.mxu1  ;;  %3017 = vmatprep.subr.mxu1 %v3358_v8 }
 0x366   : > { %3010 = vmatmul.mubr.msk.f32.vlgmr.msra.gmra.mxu1 %vm872_vm3, %v711_v26  ;;  %v868_v35 = vpop.f32.mrf.mxu1 }
 0x367   : > { %3018 = vmatpush3.msra.mxu1 %v1042_v34  ;;  %3019 = vmatprep.mubr.msk.f32.mxu1 %vm3359_vm1, %v3358_v8 }
 0x368   : > { %v3006_v37 = vpop.f32.mrf.mxu1  ;;  %3013 = vmatpush3.msk.msra.mxu0 %vm965_vm4, %v868_v35  ;;  %3027 = vmatprep.subr.mxu1 %v3358_v8  ;;  %v2842_v35 = vld [vmem:[%s3950_s9] ss:$0 sm:$0xff] }
 0x369   : > { %3022 = vmatprep.subr.mxu0 %v3358_v8  ;;  %v2843_v37 = vld [vmem:[%s3951_s10] ss:$0 sm:$0xff] }
 0x36a   : > { %3020 = vmatmul.mubr.msk.f32.vlgmr.msra.gmra.mxu1 %vm725_vm2, %v1040_v36 }
 0x36b   : > { %3029 = vmatprep.mubr.msk.f32.mxu1 %vm3359_vm1, %v3358_v8 }
 0x426   : > { %v945_v38 = vpop.f32.mrf.mxu1 }
 0x427   : > { %v949_v39 = vmul.f32 0.25, %v945_v38 }
 0x428   : > { %v3011_v40 = vpop.f32.mrf.mxu1 }
 0x429   : > { %v951_v41 = vsel %vm950_vm5, %v949_v39, -inf  ;;  %v604_v40 = vld [vmem:[%s3954_s13 + $0x38] sm:$0xff] }
 0x42a   : > { %952 = vmax.xlane.f32.xlu1 %v951_v41  ;;  %v1113_v42 = vpop.f32.mrf.mxu1  ;;  %v603_v41 = vld [vmem:[%s3954_s13 + $0x30] sm:$0xff] }
 0x42b   : > { %3028 = vmatpush3.xpose.msk.msra.mxu1 %vm872_vm3, %v1113_v42  ;;  %v602_v42 = vld [vmem:[%s3954_s13 + $0x28] sm:$0xff] }
 0x42c   : > { %v3021_v43 = vpop.f32.mrf.mxu1  ;;  %3059 = vmatprep.subr.mxu1 %v3358_v8 }
 0x42d   : > { %v601_v43 = vld [vmem:[%s3954_s13 + $0x20] sm:$0xff] }
 0x42e   : > { %3030 = vmatmul.mubr.msk.f32.vlgmr.msra.gmra.mxu1 %vm872_vm3, %v1191_v44  ;;  %v600_v44 = vld [vmem:[%s3954_s13 + $0x18] sm:$0xff] }
 0x42f   : > { %3075 = vmatprep.mubr.msk.f32.mxu1 %vm3359_vm1, %v3358_v8  ;;  %3060 = vmatpush3.msra.mxu1 %v604_v40 }
 0x430   : > { %3061 = vmatprep.subr.mxu1 %v3358_v8 }
 0x431   : > { %3062 = vmatpush3.msra.mxu1 %v603_v41 }
 0x432   : > { %3063 = vmatprep.subr.mxu1 %v3358_v8 }
 0x433   : > { %3064 = vmatpush3.msra.mxu1 %v602_v42 }
 0x434   : > { %3065 = vmatprep.subr.mxu1 %v3358_v8 }
 0x435   : > { %3066 = vmatpush3.msra.mxu1 %v601_v43 }
 0x436   : > { %3067 = vmatprep.subr.mxu1 %v3358_v8 }
 0x437   : > { %3068 = vmatpush3.msra.mxu1 %v600_v44 }
 0x438   : > { %3069 = vmatprep.subr.mxu1 %v3358_v8 }
 0x43b   : > { %1117 = vrot.lane.b32.xlu1 %v719_v28, %s3960_s30  ;;  %v595_v28 = vld [vmem:[%s3952_s11 + $0x18] sm:$0xff]  ;;  %s3983_s30 = smov 64  }
 0x4b3   : > { %v953_v45 = vpop.xlane.xlu1 %952 }
 0x4b4   : > { %v954_v46 = vsub.f32 %v949_v39, %v953_v45  ;;  %v599_v45 = vld [vmem:[%s3954_s13 + $0x10] sm:$0xff] }
 0x4b5   : > { %3070 = vmatpush3.msra.mxu1 %v599_v45 }
 0x4b6   : > { %v955_v47 = vmul.f32 1.442695, %v954_v46  ;;  %3071 = vmatprep.subr.mxu1 %v3358_v8  ;;  %v598_v46 = vld [vmem:[%s3954_s13 + $0x8] sm:$0xff] }
 0x4b7   : > { %v1118_v57 = vpop.permute.xlu1 %1117  ;;  %3072 = vmatpush3.msra.mxu1 %v598_v46 }
 0x4b8   : > { %3235 = vpow2.f32 %v955_v47  ;;  %v597_v47 = vld [vmem:[%s3954_s13] sm:$0xff]  ;;  %3073 = vmatprep.subr.mxu1 %v3358_v8 }
 0x4b9   : > { %3074 = vmatpush3.msra.mxu1 %v597_v47 }
 0x4ba   : > { %3099 = vmatprep.subr.mxu1 %v3358_v8 }
 0x4c5   : > { %v3236_v48 = vpop.eup %3235 }
 0x4c6   : > { %v957_v49 = vsel %vm950_vm5, %v3236_v48, 0.0 }
 0x4c7   : > { %958 = vadd.xlane.f32.xlu0 %v957_v49 }
 0x4ee   : > { %v1263_v50 = vpop.f32.mrf.mxu1 }
 0x4ef   : > { %v1267_v51 = vmul.f32 0.25, %v1263_v50 }
 0x4f0   : > { %v3031_v52 = vpop.f32.mrf.mxu1 }
 0x4f1   : > { %v1268_v53 = vsel %vm950_vm5, %v1267_v51, -inf }
 0x4f2   : > { %1269 = vmax.xlane.f32.xlu0 %v1268_v53 }
 0x550   : > { %v959_v54 = vpop.xlane.xlu0 %958 }
 0x551   : > { %3237 = vrcp.f32 %v959_v54 }
 0x55e   : > { %v3238_v55 = vpop.eup %3237 }
 0x55f   : > { %v961_v56 = vmul.f32 %v3238_v55, %v3236_v48  ;;  %v2844_v48 = vld [vmem:[%s3953_s12] ss:$0 sm:$0xff] }
 0x561   : > { %3015 = vmatmul.mubr.msk.f32.vlgmr.msra.gmra.mxu0 %vm950_vm5, %v961_v56 }
 0x562   : > { %3023 = vmatpush3.msra.mxu0 %v1118_v57  ;;  %3024 = vmatprep.mubr.msk.f32.mxu0 %vm3359_vm1, %v3358_v8  ;;  %v2846_v57 = vld [vmem:[%s3955_s14] ss:$0 sm:$0xff] }
 0x563   : > { %3032 = vmatprep.subr.mxu0 %v3358_v8 }
 0x565   : > { %3025 = vmatmul.mubr.msk.f32.vlgmr.msra.gmra.mxu0 %vm725_vm2, %v1040_v36 }
 0x566   : > { %3034 = vmatprep.mubr.msk.f32.mxu0 %vm3359_vm1, %v3358_v8 }
 0x57b   : > { %v1270_v58 = vpop.xlane.xlu0 %1269 }
 0x57c   : > { %v1271_v59 = vsub.f32 %v1267_v51, %v1270_v58 }
 0x57e   : > { %v1272_v60 = vmul.f32 1.442695, %v1271_v59 }
 0x580   : > { %3239 = vpow2.f32 %v1272_v60 }
 0x58d   : > { %v3240_v61 = vpop.eup %3239 }
 0x58e   : > { %v1274_v62 = vsel %vm950_vm5, %v3240_v61, 0.0 }
 0x58f   : > { %1275 = vadd.xlane.f32.xlu0 %v1274_v62 }
 0x618   : > { %v1276_v63 = vpop.xlane.xlu0 %1275 }
 0x619   : > { %3241 = vrcp.f32 %v1276_v63 }
 0x621   : > { %v1035_v1 = vpop.f32.mrf.mxu0 }
 0x623   : > { %v3016_v2 = vpop.f32.mrf.mxu0 }
 0x625   : > { %v1186_v3 = vpop.f32.mrf.mxu0 }
 0x626   : > { %v3242_v4 = vpop.eup %3241  ;;  %3033 = vmatpush3.msk.msra.mxu0 %vm965_vm4, %v1186_v3 }
 0x627   : > { %v3026_v5 = vpop.f32.mrf.mxu0  ;;  %v1278_v6 = vmul.f32 %v3242_v4, %v3240_v61  ;;  %3037 = vmatprep.subr.mxu0 %v3358_v8 }
 0x628   : > { %v2853_v5 = vld [vmem:[%s3978_s4 + $0x38] sm:$0xff] }
 0x629   : > { %3035 = vmatmul.mubr.msk.f32.vlgmr.msra.gmra.mxu0 %vm950_vm5, %v1278_v6  ;;  %v2852_v6 = vld [vmem:[%s3978_s4 + $0x30] sm:$0xff] }
 0x62a   : > { %3045 = vmatprep.mubr.msk.f32.mxu0 %vm3359_vm1, %v3358_v8  ;;  %3038 = vmatpush3.msra.mxu0 %v588_v7  ;;  %v2851_v7 = vld [vmem:[%s3978_s4 + $0x28] sm:$0xff] }
 0x62b   : > { %3039 = vmatprep.subr.mxu0 %v3358_v8 }
 0x62c   : > { %3040 = vmatpush3.msra.mxu0 %v587_v9  ;;  %v2850_v9 = vld [vmem:[%s3978_s4 + $0x20] sm:$0xff] }
 0x62d   : > { %3041 = vmatprep.subr.mxu0 %v3358_v8 }
 0x62e   : > { %3042 = vmatpush3.msra.mxu0 %v586_v10 }
 0x62f   : > { %3043 = vmatprep.subr.mxu0 %v3358_v8 }
 0x630   : > { %3044 = vmatpush3.msra.mxu0 %v585_v11 }
 0x631   : > { %3048 = vmatprep.subr.mxu0 %v3358_v8 }
 0x6e9   : > { %v1351_v12 = vpop.f32.mrf.mxu0 }
 0x6ea   : > { %1356 = vrot.lane.b32.xlu0 %v1351_v12, %s3963_s22  ;;  %s2903_s22 = sshll.u32 %s3479_s28, 7  ;;  %s3293_s28 = sshll.u32 %s3367_s18, 4  ;;  %s3294_s28 = int_to_ptr.vmem [resolvable:$false] %s3293_s28 }
 0x6eb   : > { %v3036_v13 = vpop.f32.mrf.mxu0  ;;  %s2730_s4 = scalar_lea.hbm %s3958_s17, %s2903_s22 }
 0x75c   : > { %v1357_v14 = vpop.permute.xlu0 %1356 }
 0x75d   : > { %v1359_v15 = vsel %vm872_vm3, %v1035_v1, %v1357_v14  ;;  %v2876_v14 = vld [vmem:[%s3980_s2 + $0x1] ss:$0 sm:$0xff] }
 0x75e   : > { %3046 = vmatmul.mubr.msk.f32.vlgmr.msra.gmra.mxu0 %vm606_vm0, %v1359_v15 }
 0x75f   : > { %3056 = vmatprep.mubr.msk.f32.mxu0 %vm3359_vm1, %v3358_v8  ;;  %3049 = vmatpush3.msra.mxu0 %v595_v28 }
 0x760   : > { %3050 = vmatprep.subr.mxu0 %v3358_v8 }
 0x81e   : > { %v1435_v17 = vpop.f32.mrf.mxu0 }
 0x81f   : > { %v1436_v18 = vadd.f32 %v2840_v16, %v1435_v17  ;;  %v2877_v16 = vld [vmem:[%s3981_s3 + $0x1] ss:$0 sm:$0xff] }
 0x820   : > { %v3047_v19 = vpop.f32.mrf.mxu0 }
 0x821   : > { %v3652_v20 = vadd.f32 %v1436_v18, %v3534_v0  ;;  %v594_v0 = vld [vmem:[%s3952_s11 + $0x10] sm:$0xff]  ;;  %v2878_v19 = vld [vmem:[%s3946_s5 + $0x1] ss:$0 sm:$0xff] }
 0x822   : > { %3051 = vmatpush3.msra.mxu0 %v594_v0 }
 0x823   : > { %v1440_v21 = vsel %vm606_vm0, %v3652_v20, 0.0  ;;  %3052 = vmatprep.subr.mxu0 %v3358_v8 }
 0x824   : > { %1441 = vadd.xlane.f32.xlu1 %v1440_v21  ;;  %3053 = vmatpush3.msra.mxu0 %v593_v29 }
 0x825   : > { %3054 = vmatprep.subr.mxu0 %v3358_v8 }
 0x826   : > { %3055 = vmatpush3.msra.mxu0 %v592_v30  ;;  %v2096_v30 = vld [vmem:[#allocation2 + $0xc] sm:$0xf] }
 0x827   : > { %3078 = vmatprep.subr.mxu0 %v3358_v8 }
 0x8ad   : > { %v1442_v22 = vpop.xlane.xlu1 %1441 }
 0x8ae   : > { %v1443_v23 = vmul.f32 0.03125, %v1442_v22 }
 0x8b0   : > { %v1444_v24 = vsub.f32 %v3652_v20, %v1443_v23 }
 0x8b2   : > { %v1445_v26 = vmul.f32 %v1444_v24, %v1444_v24 }
 0x8b4   : > { %v1446_v27 = vsel %vm606_vm0, %v1445_v26, 0.0 }
 0x8b5   : > { %1447 = vadd.xlane.f32.xlu0 %v1446_v27 }
 0x93e   : > { %v1448_v31 = vpop.xlane.xlu0 %1447 }
 0x93f   : > { %v1449_v32 = vmul.f32 0.03125, %v1448_v31 }
 0x941   : > { %v1450_v33 = vadd.f32 1e-05, %v1449_v32 }
 0x943   : > { %3243 = vrsqrt.f32 %v1450_v33 }
 0x950   : > { %v3244_v34 = vpop.eup %3243 }
 0x951   : > { %v1452_v36 = vmul.f32 %v3244_v34, %v1444_v24  ;;  %v1780_v24 = vld [vmem:[#allocation2 + $0x8] sm:$0xf] }
 0x953   : > { %v1459_v38 = vmul.f32 %v2842_v35, %v1452_v36 }
 0x955   : > { %v1466_v39 = vadd.f32 %v2843_v37, %v1459_v38 }
 0x957   : > { %3057 = vmatmul.mubr.msk.f32.vlgmr.msra.gmra.mxu0 %vm606_vm0, %v1466_v39 }
 0x958   : > { %3086 = vmatprep.mubr.msk.f32.mxu0 %vm3359_vm1, %v3358_v8  ;;  %3079 = vmatpush3.msra.mxu0 %v2853_v5  ;;  %v2856_v5 = vld [vmem:[%s3948_s7 + $0x28] sm:$0xff] }
 0x959   : > { %3080 = vmatprep.subr.mxu0 %v3358_v8 }
 0x95a   : > { %3081 = vmatpush3.msra.mxu0 %v2852_v6  ;;  %v2855_v6 = vld [vmem:[%s3948_s7 + $0x20] sm:$0xff] }
 0x95b   : > { %3082 = vmatprep.subr.mxu0 %v3358_v8 }
 0x95c   : > { %3083 = vmatpush3.msra.mxu0 %v2851_v7 }
 0x95d   : > { %3084 = vmatprep.subr.mxu0 %v3358_v8 }
 0x95e   : > { %3085 = vmatpush3.msra.mxu0 %v2850_v9 }
 0x95f   : > { %3089 = vmatprep.subr.mxu0 %v3358_v8 }
 0xa17   : > { %v1542_v49 = vpop.f32.mrf.mxu0 }
 0xa18   : > { %v1543_v50 = vadd.f32 %v2844_v48, %v1542_v49 }
 0xa19   : > { %v3058_v51 = vpop.f32.mrf.mxu0 }
 0xa1a   : > { %v1547_v52 = vmul.f32 0.70710677, %v1543_v50  ;;  %v1546_v54 = vmul.f32 0.5, %v1543_v50 }
 0xa1c   : > { %3245 = verf.f32 %v1547_v52 }
 0xa29   : > { %v3246_v53 = vpop.eup %3245 }
 0xa2a   : > { %v1549_v55 = vadd.f32 1.0, %v3246_v53 }
 0xa2c   : > { %v1550_v56 = vmul.f32 %v1549_v55, %v1546_v54 }
 0xa2e   : > { %3076 = vmatmul.mubr.msk.f32.vlgmr.msra.gmra.mxu1 %vm1557_vm6, %v1550_v56 }
 0xa2f   : > { %3101 = vmatprep.mubr.msk.f32.mxu1 %vm3359_vm1, %v3358_v8 }
 0xaee   : > { %v1627_v58 = vpop.f32.mrf.mxu1 }
 0xaef   : > { %v1628_v59 = vadd.f32 %v2846_v57, %v1627_v58 }
 0xaf0   : > { %v3077_v60 = vpop.f32.mrf.mxu1 }
 0xaf1   : > { %v3725_v61 = vadd.f32 %v1628_v59, %v3652_v20 }
 0xaf3   : > { %v1672_v62 = vsel %vm606_vm0, %v3725_v61, 0.0 }
 0xaf4   : > { %1673 = vadd.xlane.f32.xlu1 %v1672_v62 }
 0xb7d   : > { %v1674_v63 = vpop.xlane.xlu1 %1673 }
 0xb7e   : > { %v1675_v1 = vmul.f32 0.03125, %v1674_v63 }
 0xb80   : > { %v1676_v2 = vsub.f32 %v3725_v61, %v1675_v1 }
 0xb82   : > { %v1677_v3 = vmul.f32 %v1676_v2, %v1676_v2 }
 0xb84   : > { %v1678_v4 = vsel %vm606_vm0, %v1677_v3, 0.0  ;;  %v2858_v3 = vld [vmem:[%s3948_s7 + $0x38] sm:$0xff] }
 0xb85   : > { %1679 = vadd.xlane.f32.xlu1 %v1678_v4  ;;  %v2857_v4 = vld [vmem:[%s3948_s7 + $0x30] sm:$0xff] }
 0xc0e   : > { %v1680_v10 = vpop.xlane.xlu1 %1679 }
 0xc0f   : > { %v1681_v11 = vmul.f32 0.03125, %v1680_v10 }
 0xc11   : > { %v1682_v12 = vadd.f32 1e-05, %v1681_v11 }
 0xc13   : > { %3247 = vrsqrt.f32 %v1682_v12  ;;  %v2892_v12 = vld [vmem:[%s3949_s8 + $0x1] ss:$0 sm:$0xff] }
 0xc20   : > { %v3248_v13 = vpop.eup %3247 }
 0xc21   : > { %v1684_v15 = vmul.f32 %v3248_v13, %v1676_v2 }
 0xc23   : > { %v1691_v17 = vmul.f32 %v2876_v14, %v1684_v15 }
 0xc25   : > { %v1698_v18 = vadd.f32 %v2877_v16, %v1691_v17 }
 0xc27   : > { %3087 = vmatmul.mubr.msk.f32.vlgmr.msra.gmra.mxu0 %vm606_vm0, %v1698_v18 }
 0xc28   : > { %3091 = vmatprep.mubr.msk.f32.mxu0 %vm3359_vm1, %v3358_v8 }
 0xce7   : > { %v1774_v20 = vpop.f32.mrf.mxu0 }
 0xce8   : > { %v1775_v21 = vadd.f32 %v2878_v19, %v1774_v20 }
 0xce9   : > { %v3088_v22 = vpop.f32.mrf.mxu0 }
 0xcea   : > { %v1778_v23 = vmul.f32 %v1775_v21, %v3579_v25 }
 0xcec   : > { %2097 = vrot.lane.b32.xlu0 %v1778_v23, %s3363_s23  ;;  %1782 = vrot.lane.b32.xlu1 %v1778_v23, %s3982_s21  ;;  %s3985_s23 = smov 48  }
 0xcf0   : > { %1858 = vrot.lane.b32.xlu1 %v1778_v23, %s3983_s30 }
 0xcf4   : > { %2246 = vrot.lane.b32.xlu1 %v1775_v21, %s3984_s6  ;;  %s565_s6 = sand.u32 1, %s3345_s25  }
 0xcf5   : > { %s2719_s29 = scalar_lea.sflag [#allocation4], %s565_s6 }
 0xd5e   : > { %v1783_v26 = vpop.permute.xlu1 %1782  ;;  %v2098_v29 = vpop.permute.xlu0 %2097 }
 0xd5f   : > { %3090 = vmatpush3.msra.mxu0 %v1783_v26  ;;  %v2862_v26 = vld [vmem:[%s3952_s11 + $0x20] sm:$0xff] }
 0xd60   : > { %3092 = vmatmul.mubr.msk.f32.vlgmr.msra.gmra.mxu0 %vm725_vm2, %v1780_v24  ;;  %3094 = vmatprep.subr.mxu0 %v3358_v8 }
 0xd61   : > { %3096 = vmatprep.mubr.msk.f32.mxu0 %vm3359_vm1, %v3358_v8 }
 0xd62   : > { %v1859_v27 = vpop.permute.xlu1 %1858 }
 0xd63   : > { %3095 = vmatpush3.msra.mxu0 %v1859_v27 }
 0xd64   : > { %3097 = vmatmul.mubr.msk.f32.vlgmr.msra.gmra.mxu0 %vm725_vm2, %v1780_v24  ;;  %3104 = vmatprep.subr.mxu0 %v3358_v8  ;;  %v2863_v24 = vld [vmem:[%s3952_s11 + $0x28] sm:$0xff] }
 0xd65   : > { %3106 = vmatprep.mubr.msk.f32.mxu0 %vm3359_vm1, %v3358_v8 }
 0xd66   : > { %v2247_v37 = vpop.permute.xlu1 %2246 }
 0xe20   : > { %v1854_v28 = vpop.f32.mrf.mxu0 }
 0xe21   : > { %3100 = vmatpush3.xpose.msk.msra.mxu1 %vm872_vm3, %v1854_v28 }
 0xe22   : > { %v3093_v0 = vpop.f32.mrf.mxu0  ;;  %3109 = vmatprep.subr.mxu1 %v3358_v8 }
 0xe24   : > { %3102 = vmatmul.mubr.msk.f32.vlgmr.msra.gmra.mxu1 %vm872_vm3, %v1775_v21  ;;  %v1927_v43 = vpop.f32.mrf.mxu0 }
 0xe25   : > { %3110 = vmatpush3.msra.mxu1 %v2098_v29  ;;  %3111 = vmatprep.mubr.msk.f32.mxu1 %vm3359_vm1, %v3358_v8 }
 0xe26   : > { %3119 = vmatprep.subr.mxu1 %v3358_v8  ;;  %3105 = vmatpush3.msk.msra.mxu0 %vm965_vm4, %v1927_v43  ;;  %v3098_v44 = vpop.f32.mrf.mxu0  ;;  %v2896_v43 = vld [vmem:[%s3953_s12 + $0x1] ss:$0 sm:$0xff] }
 0xe27   : > { %3114 = vmatprep.subr.mxu0 %v3358_v8 }
 0xe28   : > { %3112 = vmatmul.mubr.msk.f32.vlgmr.msra.gmra.mxu1 %vm725_vm2, %v2096_v30 }
 0xe29   : > { %3121 = vmatprep.mubr.msk.f32.mxu1 %vm3359_vm1, %v3358_v8 }
 0xee4   : > { %v2003_v31 = vpop.f32.mrf.mxu1 }
 0xee5   : > { %v2007_v32 = vmul.f32 0.25, %v2003_v31 }
 0xee6   : > { %v3103_v33 = vpop.f32.mrf.mxu1 }
 0xee7   : > { %v2008_v34 = vsel %vm950_vm5, %v2007_v32, -inf }
 0xee8   : > { %2009 = vmax.xlane.f32.xlu1 %v2008_v34  ;;  %v2169_v35 = vpop.f32.mrf.mxu1 }
 0xee9   : > { %3120 = vmatpush3.xpose.msk.msra.mxu1 %vm872_vm3, %v2169_v35  ;;  %v2874_v35 = vld [vmem:[%s3954_s13 + $0x78] sm:$0xff] }
 0xeea   : > { %v3113_v36 = vpop.f32.mrf.mxu1  ;;  %3129 = vmatprep.subr.mxu1 %v3358_v8 }
 0xeeb   : > { %v2873_v36 = vld [vmem:[%s3954_s13 + $0x70] sm:$0xff] }
 0xeec   : > { %3122 = vmatmul.mubr.msk.f32.vlgmr.msra.gmra.mxu1 %vm872_vm3, %v2247_v37  ;;  %v2872_v37 = vld [vmem:[%s3954_s13 + $0x68] sm:$0xff] }
 0xeed   : > { %3137 = vmatprep.mubr.msk.f32.mxu1 %vm3359_vm1, %v3358_v8  ;;  %3130 = vmatpush3.msra.mxu1 %v2858_v3 }
 0xeee   : > { %3131 = vmatprep.subr.mxu1 %v3358_v8 }
 0xeef   : > { %3132 = vmatpush3.msra.mxu1 %v2857_v4  ;;  %v2900_v4 = vld [vmem:[%s3956_s15] ss:$0 sm:$0xff] }
 0xef0   : > { %3133 = vmatprep.subr.mxu1 %v3358_v8 }
 0xef1   : > { %3134 = vmatpush3.msra.mxu1 %v2856_v5 }
 0xef2   : > { %3135 = vmatprep.subr.mxu1 %v3358_v8 }
 0xef3   : > { %3136 = vmatpush3.msra.mxu1 %v2855_v6  ;;  %v2901_v6 = vld [vmem:[%s3957_s16] ss:$0 sm:$0xff] }
 0xef4   : > { %3151 = vmatprep.subr.mxu1 %v3358_v8 }
 0xef9   : > { %2173 = vrot.lane.b32.xlu1 %v1778_v23, %s3985_s23  ;;  %s3986_s23 = smov 16   ;;  %v2865_v23 = vld [vmem:[%s3952_s11 + $0x38] sm:$0xff] }
 0xf71   : > { %v2010_v38 = vpop.xlane.xlu1 %2009 }
 0xf72   : > { %v2011_v39 = vsub.f32 %v2007_v32, %v2010_v38  ;;  %v2895_v32 = vld [vmem:[%s3951_s10 + $0x1] ss:$0 sm:$0xff] }
 0xf73   : > { %v2871_v38 = vld [vmem:[%s3954_s13 + $0x60] sm:$0xff] }
 0xf74   : > { %v2012_v40 = vmul.f32 1.442695, %v2011_v39  ;;  %v2870_v39 = vld [vmem:[%s3954_s13 + $0x58] sm:$0xff] }
 0xf75   : > { %v2174_v52 = vpop.permute.xlu1 %2173 }
 0xf76   : > { %3249 = vpow2.f32 %v2012_v40  ;;  %v2869_v40 = vld [vmem:[%s3954_s13 + $0x50] sm:$0xff] }
 0xf83   : > { %v3250_v41 = vpop.eup %3249 }
 0xf84   : > { %v2014_v42 = vsel %vm950_vm5, %v3250_v41, 0.0 }
 0xf85   : > { %2015 = vadd.xlane.f32.xlu0 %v2014_v42  ;;  %v2867_v42 = vld [vmem:[%s3954_s13 + $0x40] sm:$0xff] }
 0xfac   : > { %v2319_v45 = vpop.f32.mrf.mxu1 }
 0xfad   : > { %v2323_v46 = vmul.f32 0.25, %v2319_v45 }
 0xfae   : > { %v3123_v47 = vpop.f32.mrf.mxu1 }
 0xfaf   : > { %v2324_v48 = vsel %vm950_vm5, %v2323_v46, -inf }
 0xfb0   : > { %2325 = vmax.xlane.f32.xlu0 %v2324_v48 }
0x100e   : > { %v2016_v49 = vpop.xlane.xlu0 %2015 }
0x100f   : > { %3251 = vrcp.f32 %v2016_v49 }
0x101c   : > { %v3252_v50 = vpop.eup %3251 }
0x101d   : > { %v2018_v51 = vmul.f32 %v3252_v50, %v3250_v41  ;;  %v2868_v41 = vld [vmem:[%s3954_s13 + $0x48] sm:$0xff] }
0x101f   : > { %3107 = vmatmul.mubr.msk.f32.vlgmr.msra.gmra.mxu0 %vm950_vm5, %v2018_v51 }
0x1020   : > { %3115 = vmatpush3.msra.mxu0 %v2174_v52  ;;  %3116 = vmatprep.mubr.msk.f32.mxu0 %vm3359_vm1, %v3358_v8 }
0x1021   : > { %3124 = vmatprep.subr.mxu0 %v3358_v8 }
0x1023   : > { %3117 = vmatmul.mubr.msk.f32.vlgmr.msra.gmra.mxu0 %vm725_vm2, %v2096_v30  ;;  %v2894_v30 = vld [vmem:[%s3950_s9 + $0x1] ss:$0 sm:$0xff] }
0x1024   : > { %3126 = vmatprep.mubr.msk.f32.mxu0 %vm3359_vm1, %v3358_v8 }
0x1039   : > { %v2326_v53 = vpop.xlane.xlu0 %2325 }
0x103a   : > { %v2327_v54 = vsub.f32 %v2323_v46, %v2326_v53 }
0x103c   : > { %v2328_v55 = vmul.f32 1.442695, %v2327_v54 }
0x103e   : > { %3253 = vpow2.f32 %v2328_v55 }
0x104b   : > { %v3254_v56 = vpop.eup %3253 }
0x104c   : > { %v2330_v57 = vsel %vm950_vm5, %v3254_v56, 0.0 }
0x104d   : > { %2331 = vadd.xlane.f32.xlu0 %v2330_v57 }
0x10d6   : > { %v2332_v58 = vpop.xlane.xlu0 %2331 }
0x10d7   : > { %3255 = vrcp.f32 %v2332_v58 }
0x10df   : > { %v2091_v59 = vpop.f32.mrf.mxu0 }
0x10e1   : > { %v3108_v60 = vpop.f32.mrf.mxu0 }
0x10e3   : > { %v2242_v62 = vpop.f32.mrf.mxu0 }
0x10e4   : > { %v3256_v63 = vpop.eup %3255  ;;  %3125 = vmatpush3.msk.msra.mxu0 %vm965_vm4, %v2242_v62 }
0x10e5   : > { %v3118_v1 = vpop.f32.mrf.mxu0  ;;  %v2334_v2 = vmul.f32 %v3256_v63, %v3254_v56  ;;  %3140 = vmatprep.subr.mxu0 %v3358_v8 }
0x10e7   : > { %3127 = vmatmul.mubr.msk.f32.vlgmr.msra.gmra.mxu0 %vm950_vm5, %v2334_v2 }
0x10e8   : > { %3148 = vmatprep.mubr.msk.f32.mxu0 %vm3359_vm1, %v3358_v8  ;;  %3141 = vmatpush3.msra.mxu0 %v2865_v23 }
0x10e9   : > { %3142 = vmatprep.subr.mxu0 %v3358_v8 }
0x11a7   : > { %v2407_v7 = vpop.f32.mrf.mxu0 }
0x11a8   : > { %2412 = vrot.lane.b32.xlu0 %v2407_v7, %s3986_s23  ;;  %s2821_s23 = sshll.u32 %s565_s6, 3 }
0x11a9   : > { %v3128_v9 = vpop.f32.mrf.mxu0  ;;  %s567_s21 = scalar_lea.vmem [#allocation5], %s2821_s23  ;;  %s3295_s23 = scalar_lea.vmem %s3294_s28, 256 }
0x11aa   : > { %s2732_s30 = sshll.u32 %s567_s21, 4  ;;  %s2733_s30 = int_to_ptr.vmem [resolvable:$true] %s2732_s30 }
0x11ab   : > { %s3289_s26 = scalar_lea.vmem %s2733_s30, 128  ;;  %p3296_p11 = scmp.lt.s32.totalorder %s2733_s30, %s3294_s28 }
0x11ac   : > { %p3290_p6 = scmp.ne.s32.totalorder %s2733_s30, %s3289_s26  ;;  %p3297_p12 = scmp.lt.s32.totalorder %s3295_s23, %s3289_s26 }
0x11ae   : > { %p3291_p9 = pnand %p3290_p6, %p3496_p5  ;;  %p3298_p13 = por %p3297_p12, %p3296_p11 }
0x11b0   : > { %p3292_p10 = pneg %p3291_p9 }
0x11b2   : > { %p3299_p0 = pnand %p3298_p13, %p3292_p10 }
0x121a   : > { %v2413_v10 = vpop.permute.xlu0 %2412 }
0x121b   : > { %v2415_v11 = vsel %vm872_vm3, %v2091_v59, %v2413_v10 }
0x121c   : > { %3138 = vmatmul.mubr.msk.f32.vlgmr.msra.gmra.mxu1 %vm606_vm0, %v2415_v11 }
0x121d   : > { %3167 = vmatprep.mubr.msk.f32.mxu1 %vm3359_vm1, %v3358_v8  ;;  %3152 = vmatpush3.msra.mxu1 %v2874_v35 }
0x121e   : > { %3153 = vmatprep.subr.mxu1 %v3358_v8 }
0x121f   : > { %3154 = vmatpush3.msra.mxu1 %v2873_v36 }
0x1220   : > { %3155 = vmatprep.subr.mxu1 %v3358_v8 }
0x1221   : > { %3156 = vmatpush3.msra.mxu1 %v2872_v37 }
0x1222   : > { %3157 = vmatprep.subr.mxu1 %v3358_v8 }
0x1223   : > { %3158 = vmatpush3.msra.mxu1 %v2871_v38 }
0x1224   : > { %3159 = vmatprep.subr.mxu1 %v3358_v8 }
0x1225   : > { %3160 = vmatpush3.msra.mxu1 %v2870_v39 }
0x1226   : > { %3161 = vmatprep.subr.mxu1 %v3358_v8 }
0x1227   : > { %3162 = vmatpush3.msra.mxu1 %v2869_v40 }
0x1228   : > { %3163 = vmatprep.subr.mxu1 %v3358_v8 }
0x1229   : > { %3164 = vmatpush3.msra.mxu1 %v2868_v41 }
0x122a   : > { %3165 = vmatprep.subr.mxu1 %v3358_v8 }
0x122b   : > { %3166 = vmatpush3.msra.mxu1 %v2867_v42 }
0x12dc   : > { %v2491_v13 = vpop.f32.mrf.mxu1 }
0x12dd   : > { %v2492_v14 = vadd.f32 %v2892_v12, %v2491_v13 }
0x12de   : > { %v3139_v15 = vpop.f32.mrf.mxu1 }
0x12df   : > { %v3830_v16 = vadd.f32 %v2492_v14, %v3725_v61  ;;  %v2864_v61 = vld [vmem:[%s3952_s11 + $0x30] sm:$0xff] }
0x12e0   : > { %3143 = vmatpush3.msra.mxu0 %v2864_v61 }
0x12e1   : > { %v2496_v17 = vsel %vm606_vm0, %v3830_v16, 0.0  ;;  %3144 = vmatprep.subr.mxu0 %v3358_v8 }
0x12e2   : > { %2497 = vadd.xlane.f32.xlu1 %v2496_v17  ;;  %3145 = vmatpush3.msra.mxu0 %v2863_v24 }
0x12e3   : > { %3146 = vmatprep.subr.mxu0 %v3358_v8  ;;  %v2898_v8 = vld [vmem:[%s3955_s14 + $0x1] ss:$0 sm:$0xff] }
0x12e4   : > { %3147 = vmatpush3.msra.mxu0 %v2862_v26 }
0x136b   : > { %v2498_v18 = vpop.xlane.xlu1 %2497 }
0x136c   : > { %v2499_v19 = vmul.f32 0.03125, %v2498_v18 }
0x136e   : > { %v2500_v20 = vsub.f32 %v3830_v16, %v2499_v19 }
0x1370   : > { %v2501_v21 = vmul.f32 %v2500_v20, %v2500_v20 }
0x1372   : > { %v2502_v22 = vsel %vm606_vm0, %v2501_v21, 0.0 }
0x1373   : > { %2503 = vadd.xlane.f32.xlu0 %v2502_v22 }
0x13fc   : > { %v2504_v27 = vpop.xlane.xlu0 %2503 }
0x13fd   : > { %v2505_v28 = vmul.f32 0.03125, %v2504_v27 }
0x13ff   : > { %v2506_v0 = vadd.f32 1e-05, %v2505_v28 }
0x1401   : > { %3257 = vrsqrt.f32 %v2506_v0 }
0x140e   : > { %v3258_v29 = vpop.eup %3257 }
0x140f   : > { %v2508_v31 = vmul.f32 %v3258_v29, %v2500_v20 }
0x1411   : > { %v2515_v33 = vmul.f32 %v2894_v30, %v2508_v31 }
0x1413   : > { %v2522_v34 = vadd.f32 %v2895_v32, %v2515_v33 }
0x1415   : > { %3149 = vmatmul.mubr.msk.f32.vlgmr.msra.gmra.mxu0 %vm606_vm0, %v2522_v34 }
0x14d5   : > { %v2598_v44 = vpop.f32.mrf.mxu0 }
0x14d6   : > { %v2599_v45 = vadd.f32 %v2896_v43, %v2598_v44 }
0x14d7   : > { %v3150_v46 = vpop.f32.mrf.mxu0 }
0x14d8   : > { %v2603_v47 = vmul.f32 0.70710677, %v2599_v45  ;;  %v2602_v49 = vmul.f32 0.5, %v2599_v45 }
0x14da   : > { %3259 = verf.f32 %v2603_v47 }
0x14e7   : > { %v3260_v48 = vpop.eup %3259 }
0x14e8   : > { %v2605_v50 = vadd.f32 1.0, %v3260_v48 }
0x14ea   : > { %v2606_v51 = vmul.f32 %v2605_v50, %v2602_v49 }
0x14ec   : > { %3168 = vmatmul.mubr.msk.f32.vlgmr.msra.gmra.mxu1 %vm1557_vm6, %v2606_v51 }
0x15ac   : > { %v2682_v52 = vpop.f32.mrf.mxu1 }
0x15ad   : > { %v2683_v53 = vadd.f32 %v2898_v8, %v2682_v52 }
0x15ae   : > { %v3169_v54 = vpop.f32.mrf.mxu1 }
0x15af   : > { %v2686_v55 = vadd.f32 %v2683_v53, %v3830_v16 }
0x15b1   : > { %v2689_v56 = vsel %vm606_vm0, %v2686_v55, 0.0 }
0x15b2   : > { %2690 = vadd.xlane.f32.xlu1 %v2689_v56 }
0x163b   : > { %v2691_v57 = vpop.xlane.xlu1 %2690 }
0x163c   : > { %v2692_v58 = vmul.f32 0.03125, %v2691_v57 }
0x163e   : > { %v2693_v59 = vsub.f32 %v2686_v55, %v2692_v58 }
0x1640   : > { %v2694_v60 = vmul.f32 %v2693_v59, %v2693_v59 }
0x1642   : > { %v2695_v62 = vsel %vm606_vm0, %v2694_v60, 0.0 }
0x1643   : > { %2696 = vadd.xlane.f32.xlu1 %v2695_v62 }
0x16cc   : > { %v2697_v63 = vpop.xlane.xlu1 %2696 }
0x16cd   : > { %v2698_v1 = vmul.f32 0.03125, %v2697_v63 }
0x16cf   : > { %v2699_v2 = vadd.f32 1e-05, %v2698_v1 }
0x16d1   : > { %3261 = vrsqrt.f32 %v2699_v2 }
0x16de   : > { %v3262_v3 = vpop.eup %3261 }
0x16df   : > { %v2701_v5 = vmul.f32 %v3262_v3, %v2693_v59 }
0x16e1   : > { %v2708_v7 = vmul.f32 %v2900_v4, %v2701_v5 }
0x16e3   : > { %v2715_v9 = vadd.f32 %v2901_v6, %v2708_v7 }
0x16e5   : > { %v2716_v10 = vmul.f32 %v2715_v9, %v3579_v25 }
0x16e7   : > { %2717 = vst.msk [vmem:[%s567_s21] sm:$0xff] %vm606_vm0, %v2716_v10 }
0x16e8   : > { %3302 = shalt.err (!%p3299_p0)
}
0x16e9   : > { %s3303_s2 = scalar_lea.hbm %s2730_s4, 128  ;;  %s3307_s19 = scalar_lea.hbm %s3958_s17, 256 }
0x16ea   : > { %p3304_p1 = scmp.ne.s32.totalorder %s2730_s4, %s3303_s2  ;;  %p3308_p4 = scmp.lt.s32.totalorder %s2730_s4, %s3958_s17 }
0x16eb   : > { %p3309_p7 = scmp.lt.s32.totalorder %s3307_s19, %s3303_s2 }
0x16ec   : > { %p3305_p2 = pnand %p3304_p1, %p3496_p5 }
0x16ed   : > { %p3310_p8 = por %p3309_p7, %p3308_p4 }
0x16ee   : > { %p3306_p3 = pneg %p3305_p2 }
0x16f0   : > { %p3311_p6 = pnand %p3310_p8, %p3306_p3 }
0x16f2   : > { %3314 = shalt.err (!%p3311_p6)
}
0x16f3   : > { %3174 = dma.vmem_to_hbm [thread:$0]  (%p3496_p5), %s2733_s30, 128, %s2730_s4, %s2719_s29  }
0x16f4 PF: > { %p3186_p9 = scmp.ge.s32.totalorder %s3353_s27, 2  ;;  %s2744_s26 = sand.u32 1, %s3341_s24  }
0x16f5   : > { %p3987_p10 = scmp.ne.s32.totalorder %s3974_s20, 0  ;;  %s2745_s18 = scalar_lea.sflag [#allocation4], %s2744_s26 }
0x16f7   : > { %p3181_p11 = pnand %p3186_p9, %p3987_p10 }
0x16f9   : > { %p3182_p12 = pneg %p3181_p11 }
0x16fb   : > { %3336 = dma.done.wait (%p3182_p12), %s2745_s18, 128  }
0x16fc   : > { %3338 = vsyncadd (%p3182_p12), %s2745_s18, 4294967168  ;;  %s3988_s28 = sld [smem:[#allocation8_spill]]  ;;  %p28_p13 = scmp.ge.s32.totalorder %s3483_s0, 4  }
0x16fd   : > { %s3989_s26 = sld [smem:[#allocation9_spill]]  ;;  %s3990_s24 = smov %s3345_s25 }
0x16fe   : > { %s3992_s27 = smov %s3483_s0  ;;  %30 = sbr.rel (!%p28_p13) target bundleno = 11 (0xb), region = 146 }
0x1702   : > { %s3991_s25 = smov %s3988_s28 }
0x1703   :  { %2750 = vsyncpa [#allocation3], 1 }
0x1704   :  { %2752 = vsyncpa [#allocation3 + $0x1], 1 }
0x1705   :  { %2753 = vsyncpa [#allocation4], 1 }
0x1706   :  { %2755 = vsyncpa [#allocation4 + $0x1], 1 }

</bundles_post_ra>
